<compile_context>
chip_gen: v5e
topology: v5e:2x2
jax: 0.10.0
libtpu: 0.0.40
codegen_flags: <defaults>
</compile_context>

<pallas_src>
import math

import jax
import jax.numpy as jnp
from jax.experimental import pallas as pl
from jax.experimental.pallas import tpu as pltpu


def _pad128(n):
    return ((int(n) + 127) // 128) * 128


def _round_up(n, m):
    return ((int(n) + m - 1) // m) * m


_SQRT_2_OVER_PI = 0.7978845608028654

# ops whose matmul output goes through a GELU (used for the cost estimate)
_GELU_OP_NAMES = frozenset({
    "init1", "init2", "d1a", "d1b", "d2a", "d2b",
    "u1a", "u1b", "u1c", "u1d", "u2a", "u2b", "u2c", "u2d",
    "temb_in", "cemb_in",      # both outputs of each fused embedding matmul
})


def _build_plan(x_dim, y_dim):
    """All nn.Linear layers of ContextUnet as kernel ops (insertion-ordered dict).

    slabs : list of padded (KP, NP) weight-slab shapes, one per matmul operand.
    ops   : name -> descriptor:
      ("lin",  w, b, k, n)              y = h @ W + b
      ("cat",  wa, ka, wb, kb, b, n)    y = h @ Wa + extra @ Wb + b   (torch.cat -> Linear)
      ("lin2", w, k, ba, na, bb, nb)    two Linears sharing input h, fused along N
    """
    y, y2 = y_dim, 2 * y_dim
    slabs, ops = [], {}
    n_biases = 0

    def new_slab(kp, npad):
        slabs.append((kp, npad))
        return len(slabs) - 1

    def new_bias():
        nonlocal n_biases
        n_biases += 1
        return n_biases - 1

    def lin(name, k, n):
        ops[name] = ("lin", new_slab(_pad128(k), _pad128(n)), new_bias(), k, n)

    def cat(name, ka, kb, n):
        wa = new_slab(_pad128(ka), _pad128(n))
        wb = new_slab(_pad128(kb), _pad128(n))
        ops[name] = ("cat", wa, ka, wb, kb, new_bias(), n)

    def lin2(name, k, na, nb):
        w = new_slab(_pad128(k), _pad128(na) + _pad128(nb))
        ops[name] = ("lin2", w, k, new_bias(), na, new_bias(), nb)

    lin("init1", y, y); lin("init2", y, y)           # init_conv (is_res, same_channels)
    lin("d1a", y, y);   lin("d1b", y, y)             # down1
    lin("d2a", y, y2);  lin("d2b", y2, y2)           # down2
    lin2("temb_in", 1, y2, y)                        # timeembed1/2 first Linear (shared t)
    lin("temb1_out", y2, y2); lin("temb2_out", y, y)
    lin2("cemb_in", x_dim, y2, y)                    # contextembed1/2 first Linear (shared c)
    lin("cemb1_out", y2, y2); lin("cemb2_out", y, y)
    lin("up0", y2, y2)                               # up0 Linear (+ReLU)
    cat("up1_in", y2, y2, y)                         # up1 Linear(cat(h, down2))
    lin("u1a", y, y); lin("u1b", y, y); lin("u1c", y, y); lin("u1d", y, y)
    cat("up2_in", y, y, y)                           # up2 Linear(cat(h, down1))
    lin("u2a", y, y); lin("u2b", y, y); lin("u2c", y, y); lin("u2d", y, y)
    cat("out_in", y, y, y)                           # out Linear(cat(up3, x)) (+ReLU)
    lin("out2", y, y)
    return slabs, n_biases, ops


def _group_slabs(slabs):
    """Group slabs by identical padded shape into per-shape stacks.

    Returns (groups, slab_to_pos):
      groups      : list of ((kp, np), [slab indices]) in order of first appearance
      slab_to_pos : slab index -> (group index, row within the group stack)
    """
    shape_to_gid, groups, slab_to_pos = {}, [], {}
    for s, shp in enumerate(slabs):
        if shp not in shape_to_gid:
            shape_to_gid[shp] = len(groups)
            groups.append((shp, []))
        g = shape_to_gid[shp]
        slab_to_pos[s] = (g, len(groups[g][1]))
        groups[g][1].append(s)
    return groups, slab_to_pos


def init_params(key, x_dim, y_dim, *, weight_dtype=jnp.bfloat16):
    """PyTorch-style U(+/- 1/sqrt(fan_in)) init, packed into per-shape padded stacks.

    Weights are stored transposed ((in, out) so y = x @ W + b), zero-padded to their
    group's (KP, NP) and stacked; biases are stacked into one f32 (n_biases, NP_max).
    """
    slabs, n_biases, ops = _build_plan(x_dim, y_dim)
    groups, slab_to_pos = _group_slabs(slabs)
    w_groups = [jnp.zeros((len(idxs), kp, npad), jnp.float32)
                for (kp, npad), idxs in groups]

    np_max = 128
    for op in ops.values():
        if op[0] == "lin":
            np_max = max(np_max, _pad128(op[4]))
        elif op[0] == "cat":
            np_max = max(np_max, _pad128(op[6]))
        else:  # lin2
            np_max = max(np_max, _pad128(op[4]), _pad128(op[6]))
    b_stack = jnp.zeros((n_biases, np_max), jnp.float32)

    def set_w(slab, rows, col0, W):
        g, r = slab_to_pos[slab]
        w_groups[g] = w_groups[g].at[r, :rows, col0:col0 + W.shape[1]].set(W)

    keys = jax.random.split(key, len(ops))
    for op, kk in zip(ops.values(), keys):
        if op[0] == "lin":
            _, w, b, k, n = op
            bound = 1.0 / math.sqrt(k)
            kw, kb = jax.random.split(kk)
            set_w(w, k, 0, jax.random.uniform(kw, (k, n), jnp.float32, -bound, bound))
            b_stack = b_stack.at[b, :n].set(
                jax.random.uniform(kb, (n,), jnp.float32, -bound, bound))
        elif op[0] == "cat":
            _, wa, ka, wb, kbd, b, n = op
            bound = 1.0 / math.sqrt(ka + kbd)            # torch Linear fan_in = ka + kb
            kw, kb = jax.random.split(kk)
            W = jax.random.uniform(kw, (ka + kbd, n), jnp.float32, -bound, bound)
            set_w(wa, ka, 0, W[:ka])
            set_w(wb, kbd, 0, W[ka:])
            b_stack = b_stack.at[b, :n].set(
                jax.random.uniform(kb, (n,), jnp.float32, -bound, bound))
        else:  # lin2: two independent torch Linears sharing the same input
            _, w, k, ba, na, bb, nb = op
            bound = 1.0 / math.sqrt(k)
            kwa, kba, kwb, kbb = jax.random.split(kk, 4)
            set_w(w, k, 0, jax.random.uniform(kwa, (k, na), jnp.float32, -bound, bound))
            set_w(w, k, _pad128(na),
                  jax.random.uniform(kwb, (k, nb), jnp.float32, -bound, bound))
            b_stack = b_stack.at[ba, :na].set(
                jax.random.uniform(kba, (na,), jnp.float32, -bound, bound))
            b_stack = b_stack.at[bb, :nb].set(
                jax.random.uniform(kbb, (nb,), jnp.float32, -bound, bound))
    return {"w": tuple(w.astype(weight_dtype) for w in w_groups), "b": b_stack}


def _gelu(h):
    # tanh-approximate GELU: the transcendental lands on the EUP slot (co-issues with MXU/VPU).
    # TODO(synk): use exact erf GELU (lax.erf) if bit-parity with torch.nn.GELU() is needed.
    return 0.5 * h * (1.0 + jnp.tanh(_SQRT_2_OVER_PI * (h + 0.044715 * (h * h * h))))


def _make_kernel(ops, slab_to_pos, n_groups, compute_dtype):
    def kernel(x_ref, c_ref, t_ref, *rest):
        w_refs = rest[:n_groups]
        b_ref = rest[n_groups]
        o_ref = rest[n_groups + 1]

        def wplane(slab):
            g, r = slab_to_pos[slab]
            return w_refs[g][r]                          # full (KP, NP) plane, no sub-views

        def bias(b_idx, n):
            return b_ref[b_idx:b_idx + 1, :_pad128(n)]   # (1, NP) f32 row, broadcast over rows

        def linear(h, name, extra=None):
            op = ops[name]
            if op[0] == "lin":
                _, w, b, _k, n = op
                acc = jnp.dot(h, wplane(w), preferred_element_type=jnp.float32)
            else:  # "cat": Linear applied to torch.cat((h, extra), 1) as a split matmul
                _, wa, _ka, wb, _kb, b, n = op
                acc = (jnp.dot(h, wplane(wa), preferred_element_type=jnp.float32)
                       + jnp.dot(extra, wplane(wb), preferred_element_type=jnp.float32))
            return acc + bias(b, n)

        def linear2(h, name):
            # two Linears sharing input h, fused along N to fill the 256-wide MXU
            _, w, _k, ba, na, bb, nb = ops[name]
            acc = jnp.dot(h, wplane(w), preferred_element_type=jnp.float32)
            npa, npb = _pad128(na), _pad128(nb)
            return acc[:, :npa] + bias(ba, na), acc[:, npa:npa + npb] + bias(bb, nb)

        # Activations are cast to compute_dtype exactly ONCE at each layer output; the
        # nonlinear math stays on the f32 accumulator (v5e has no bf16 VALU/EUP).
        def act(acc):
            return _gelu(acc).astype(compute_dtype)

        def relu(acc):
            return jnp.maximum(acc, 0.0).astype(compute_dtype)

        def emb(acc):
            return acc.astype(compute_dtype)

        x = x_ref[...].astype(compute_dtype)      # (TB, yp), padded lanes are exactly zero
        c = c_ref[...].astype(compute_dtype)      # (TB, xp)
        t = t_ref[...].astype(compute_dtype)      # (TB, 128) -- t in lane 0, rest zero

        # init_conv: ResidualBlock(y, y, is_res=True, same_channels)
        x1 = act(linear(x, "init1"))
        x2 = act(linear(x1, "init2"))
        xi = ((x + x2) / 1.414).astype(compute_dtype)   # literal 1.414 as in the reference

        # down path (plain ResidualBlocks: gelu(lin(gelu(lin(.)))))
        down1 = act(linear(act(linear(xi, "d1a")), "d1b"))
        down2 = act(linear(act(linear(down1, "d2a")), "d2b"))

        # EmbedFC: Linear -> GELU -> Linear  (first Linears fused pairwise along N)
        t1p, t2p = linear2(t, "temb_in")
        temb1 = emb(linear(act(t1p), "temb1_out"))
        temb2 = emb(linear(act(t2p), "temb2_out"))
        c1p, c2p = linear2(c, "cemb_in")
        cemb1 = emb(linear(act(c1p), "cemb1_out"))
        cemb2 = emb(linear(act(c2p), "cemb2_out"))

        # up0: Linear + ReLU
        up1 = relu(linear(down2, "up0"))

        # up1 = UnetUp(4y, y)(cemb1*up1 + temb1, down2)
        h = emb(linear(cemb1 * up1 + temb1, "up1_in", extra=down2))
        h = act(linear(act(linear(h, "u1a")), "u1b"))
        up2 = act(linear(act(linear(h, "u1c")), "u1d"))

        # up2 = UnetUp(2y, y)(cemb2*up2 + temb2, down1)
        h = emb(linear(cemb2 * up2 + temb2, "up2_in", extra=down1))
        h = act(linear(act(linear(h, "u2a")), "u2b"))
        up3 = act(linear(act(linear(h, "u2c")), "u2d"))

        # out head: Linear(cat(up3, x)) -> ReLU -> Linear
        h = relu(linear(up3, "out_in", extra=xi))
        o_ref[...] = linear(h, "out2").astype(o_ref.dtype)

    return kernel


def context_unet(x, c, t, params, *, block_b=256):
    """ContextUnet forward. x:(B,y_dim) c:(B,x_dim) t:(B,) -> (B,y_dim) float32."""
    w_groups = tuple(params["w"])
    b_stack = params["b"]
    compute_dtype = w_groups[0].dtype
    B, y_dim = x.shape
    x_dim = c.shape[1]

    slabs, _, ops = _build_plan(x_dim, y_dim)
    groups, slab_to_pos = _group_slabs(slabs)
    n_groups = len(groups)
    assert len(w_groups) == n_groups, "params do not match this (x_dim, y_dim) plan"

    yp, xp, tp = _pad128(y_dim), _pad128(x_dim), 128
    y2p = _pad128(2 * y_dim)

    w_bytes = sum(int(w.size) * w.dtype.itemsize for w in w_groups)
    b_bytes = int(b_stack.size) * b_stack.dtype.itemsize

    # generation-aware VMEM budget (~105 MiB on v5e/v6e, ~52 MiB on v7x headroom)
    try:
        vmem_cap = int(pltpu.get_tpu_info().vmem_capacity_bytes)
    except Exception:
        vmem_cap = 64 << 20
    vmem_budget = int(0.82 * vmem_cap)

    def vmem_need(tb_):
        io = 2 * 4 * tb_ * (2 * yp + xp + tp)    # double-buffered f32 I/O tiles
        live = 16 * 4 * tb_ * y2p                # generous live-activation estimate
        return w_bytes + b_bytes + io + live + (4 << 20)

    # batch block: big enough to amortize the per-grid-step overhead, but >= 2 blocks
    # whenever B >= 16 so both v7x TensorCores get work; shrink when VMEM-tight.
    tb = max(8, min(_round_up(block_b, 8), _round_up((B + 1) // 2, 8)))
    while tb > 8 and vmem_need(tb) > vmem_budget:
        tb = max(8, _round_up(tb // 2, 8))
    b_pad = _round_up(B, tb)
    n_blocks = b_pad // tb
    vmem_limit = min(max(vmem_need(tb), 32 << 20), vmem_budget)

    # lane-dense, sublane-aligned padded inputs (plain pads; no full-size zero buffers)
    x_p = jnp.pad(x.astype(jnp.float32), ((0, b_pad - B), (0, yp - y_dim)))
    c_p = jnp.pad(c.astype(jnp.float32), ((0, b_pad - B), (0, xp - x_dim)))
    t_p = jnp.pad(t.reshape(B, 1).astype(jnp.float32), ((0, b_pad - B), (0, tp - 1)))

    # cost estimate over padded sizes (= work actually issued)
    mm, trans = 0, 0
    for name, op in ops.items():
        if op[0] == "lin":
            _, _, _, k, n = op
            mm += _pad128(k) * _pad128(n)
            if name in _GELU_OP_NAMES:
                trans += _pad128(n)
        elif op[0] == "cat":
            _, _, ka, _, kbd, _, n = op
            mm += (_pad128(ka) + _pad128(kbd)) * _pad128(n)
        else:  # lin2
            _, _, k, _, na, _, nb = op
            mm += _pad128(k) * (_pad128(na) + _pad128(nb))
            if name in _GELU_OP_NAMES:
                trans += _pad128(na) + _pad128(nb)
    io_bytes = 4 * b_pad * (2 * yp + xp + tp)
    cost = pl.CostEstimate(flops=int(2 * b_pad * mm),
                           transcendentals=int(b_pad * trans),
                           bytes_accessed=int(w_bytes + b_bytes + io_bytes))

    kernel = _make_kernel(ops, slab_to_pos, n_groups, compute_dtype)

    in_specs = [
        pl.BlockSpec((tb, yp), lambda i: (i, 0)),
        pl.BlockSpec((tb, xp), lambda i: (i, 0)),
        pl.BlockSpec((tb, tp), lambda i: (i, 0)),
    ]
    # weights/biases: constant block index (resident across the whole grid) and
    # single-buffered so the parameter footprint is not doubled in VMEM.
    for w in w_groups:
        in_specs.append(pl.BlockSpec(w.shape, lambda i: (0, 0, 0),
                                     pipeline_mode=pl.Buffered(1)))
    in_specs.append(pl.BlockSpec(b_stack.shape, lambda i: (0, 0),
                                 pipeline_mode=pl.Buffered(1)))

    out = pl.pallas_call(
        kernel,
        out_shape=jax.ShapeDtypeStruct((b_pad, yp), jnp.float32),
        grid=(n_blocks,),
        in_specs=in_specs,
        out_specs=pl.BlockSpec((tb, yp), lambda i: (i, 0)),
        compiler_params=pltpu.CompilerParams(
            dimension_semantics=("parallel",),      # v7x: batch blocks split over 2 TCs
            vmem_limit_bytes=vmem_limit),
        cost_estimate=cost,
    )(x_p, c_p, t_p, *w_groups, b_stack)
    return out[:B, :y_dim]


def _reference_forward(x, c, t, params, x_dim, y_dim):
    """Pure-JAX f32 reference using the same packed (bf16) weights, for a tolerance check."""
    slabs, _, ops = _build_plan(x_dim, y_dim)
    _, slab_to_pos = _group_slabs(slabs)
    wg = [w.astype(jnp.float32) for w in params["w"]]
    bs = params["b"]

    def W(slab, k, n, col0=0):
        g, r = slab_to_pos[slab]
        return wg[g][r, :k, col0:col0 + n]

    def lin(h, name):
        _, w, b, k, n = ops[name]
        return h @ W(w, k, n) + bs[b, :n]

    def catlin(h, extra, name):
        _, wa, ka, wb, kb, b, n = ops[name]
        return h @ W(wa, ka, n) + extra @ W(wb, kb, n) + bs[b, :n]

    def lin2(h, name):
        _, w, k, ba, na, bb, nb = ops[name]
        return (h @ W(w, k, na) + bs[ba, :na],
                h @ W(w, k, nb, col0=_pad128(na)) + bs[bb, :nb])

    gelu = lambda v: 0.5 * v * (1.0 + jnp.tanh(_SQRT_2_OVER_PI * (v + 0.044715 * v ** 3)))
    relu = lambda v: jnp.maximum(v, 0.0)

    x = x.astype(jnp.float32)
    c = c.astype(jnp.float32)
    t = t.reshape(-1, 1).astype(jnp.float32)

    x1 = gelu(lin(x, "init1")); x2 = gelu(lin(x1, "init2"))
    xi = (x + x2) / 1.414
    down1 = gelu(lin(gelu(lin(xi, "d1a")), "d1b"))
    down2 = gelu(lin(gelu(lin(down1, "d2a")), "d2b"))
    t1p, t2p = lin2(t, "temb_in")
    temb1 = lin(gelu(t1p), "temb1_out"); temb2 = lin(gelu(t2p), "temb2_out")
    c1p, c2p = lin2(c, "cemb_in")
    cemb1 = lin(gelu(c1p), "cemb1_out"); cemb2 = lin(gelu(c2p), "cemb2_out")
    up1 = relu(lin(down2, "up0"))
    h = catlin(cemb1 * up1 + temb1, down2, "up1_in")
    h = gelu(lin(gelu(lin(h, "u1a")), "u1b"))
    up2 = gelu(lin(gelu(lin(h, "u1c")), "u1d"))
    h = catlin(cemb2 * up2 + temb2, down1, "up2_in")
    h = gelu(lin(gelu(lin(h, "u2a")), "u2b"))
    up3 = gelu(lin(gelu(lin(h, "u2c")), "u2d"))
    h = relu(catlin(up3, xi, "out_in"))
    return lin(h, "out2")


if __name__ == "__main__":
    B, x_dim, y_dim = 4, 8, 16
    key = jax.random.PRNGKey(0)
    kx, kc, kt, kp = jax.random.split(key, 4)

    x = jax.random.normal(kx, (B, y_dim), jnp.float32)   # "image" features
    c = jax.random.normal(kc, (B, x_dim), jnp.float32)   # context vector
    t = jax.random.uniform(kt, (B,), jnp.float32)        # per-example timestep scalar
    params = init_params(kp, x_dim, y_dim)

    out = jax.jit(context_unet)(x, c, t, params)
    jax.block_until_ready(out)
    assert out.shape == (B, y_dim) and out.dtype == jnp.float32

    # loose-tolerance check vs a pure-JAX f32 reference (bf16 activation carry + bf16
    # MXU operands in the kernel are the only deviation sources).
    ref = _reference_forward(x, c, t, params, x_dim, y_dim)
    max_err = float(jnp.max(jnp.abs(out - ref)))
    assert jnp.allclose(out, ref, atol=1e-1, rtol=1e-1), f"max abs err {max_err}"
    print("KERNEL_OK")
</pallas_src>

<mosaic_0001>
module attributes {stable_mosaic.version = 11 : i64} {
  func.func @kernel(%arg0: i32, %arg1: memref<8x128xf32, #tpu.memory_space<vmem>>, %arg2: memref<8x128xf32, #tpu.memory_space<vmem>>, %arg3: memref<8x128xf32, #tpu.memory_space<vmem>>, %arg4: memref<26x128x128xbf16, #tpu.memory_space<vmem>>, %arg5: memref<2x128x256xbf16, #tpu.memory_space<vmem>>, %arg6: memref<27x128xf32, #tpu.memory_space<vmem>>, %arg7: memref<8x128xf32, #tpu.memory_space<vmem>>) attributes {dimension_semantics = [#tpu.dimension_semantics<parallel>], iteration_bounds = array<i64: 1>, scalar_prefetch = 0 : i64, scratch_operands = 0 : i64, tpu.core_type = #tpu.core_type<tc>, window_params = [{transform_indices = @transform_0, window_bounds = array<i64: 8, 128>}, {transform_indices = @transform_1, window_bounds = array<i64: 8, 128>}, {transform_indices = @transform_2, window_bounds = array<i64: 8, 128>}, {pipeline_mode = #tpu.pipeline_mode<synchronous>, transform_indices = @transform_3, window_bounds = array<i64: 26, 128, 128>}, {pipeline_mode = #tpu.pipeline_mode<synchronous>, transform_indices = @transform_4, window_bounds = array<i64: 2, 128, 256>}, {pipeline_mode = #tpu.pipeline_mode<synchronous>, transform_indices = @transform_5, window_bounds = array<i64: 27, 128>}, {transform_indices = @transform_6, window_bounds = array<i64: 8, 128>}]} {
    %c0 = arith.constant 0 : index
    %c0_0 = arith.constant 0 : index
    %0 = vector.load %arg1[%c0, %c0_0] : memref<8x128xf32, #tpu.memory_space<vmem>>, vector<8x128xf32>
    %1 = arith.truncf %0 : vector<8x128xf32> to vector<8x128xbf16>
    %c0_1 = arith.constant 0 : index
    %c0_2 = arith.constant 0 : index
    %2 = vector.load %arg2[%c0_1, %c0_2] : memref<8x128xf32, #tpu.memory_space<vmem>>, vector<8x128xf32>
    %3 = arith.truncf %2 : vector<8x128xf32> to vector<8x128xbf16>
    %c0_3 = arith.constant 0 : index
    %c0_4 = arith.constant 0 : index
    %4 = vector.load %arg3[%c0_3, %c0_4] : memref<8x128xf32, #tpu.memory_space<vmem>>, vector<8x128xf32>
    %5 = arith.truncf %4 : vector<8x128xf32> to vector<8x128xbf16>
    %c0_5 = arith.constant 0 : index
    %c0_6 = arith.constant 0 : index
    %c0_7 = arith.constant 0 : index
    %6 = vector.load %arg4[%c0_5, %c0_6, %c0_7] : memref<26x128x128xbf16, #tpu.memory_space<vmem>>, vector<1x128x128xbf16>
    %7 = vector.shape_cast %6 : vector<1x128x128xbf16> to vector<128x128xbf16>
    %cst = arith.constant dense<0.000000e+00> : vector<8x128xf32>
    %8 = tpu.matmul %1, %7, %cst {dimension_numbers = #tpu.dot_dimension_numbers<[1], [0], [0], [1], [0, 0, 1, 1], [], []>} : vector<8x128xbf16>, vector<128x128xbf16>, vector<8x128xf32> -> vector<8x128xf32>
    %c0_8 = arith.constant 0 : index
    %c0_9 = arith.constant 0 : index
    %9 = vector.load %arg6[%c0_8, %c0_9] : memref<27x128xf32, #tpu.memory_space<vmem>>, vector<1x128xf32>
    %10 = vector.broadcast %9 : vector<1x128xf32> to vector<8x128xf32>
    %11 = arith.addf %8, %10 : vector<8x128xf32>
    %cst_10 = arith.constant 5.000000e-01 : f32
    %12 = vector.broadcast %cst_10 : f32 to vector<8x128xf32>
    %13 = arith.mulf %12, %11 : vector<8x128xf32>
    %14 = arith.mulf %11, %11 : vector<8x128xf32>
    %15 = arith.mulf %14, %11 : vector<8x128xf32>
    %cst_11 = arith.constant 4.471500e-02 : f32
    %16 = vector.broadcast %cst_11 : f32 to vector<8x128xf32>
    %17 = arith.mulf %16, %15 : vector<8x128xf32>
    %18 = arith.addf %11, %17 : vector<8x128xf32>
    %cst_12 = arith.constant 0.797884583 : f32
    %19 = vector.broadcast %cst_12 : f32 to vector<8x128xf32>
    %20 = arith.mulf %19, %18 : vector<8x128xf32>
    %21 = math.tanh %20 : vector<8x128xf32>
    %cst_13 = arith.constant 1.000000e+00 : f32
    %22 = vector.broadcast %cst_13 : f32 to vector<8x128xf32>
    %23 = arith.addf %22, %21 : vector<8x128xf32>
    %24 = arith.mulf %13, %23 : vector<8x128xf32>
    %25 = arith.truncf %24 : vector<8x128xf32> to vector<8x128xbf16>
    %c1 = arith.constant 1 : index
    %c0_14 = arith.constant 0 : index
    %c0_15 = arith.constant 0 : index
    %26 = vector.load %arg4[%c1, %c0_14, %c0_15] : memref<26x128x128xbf16, #tpu.memory_space<vmem>>, vector<1x128x128xbf16>
    %27 = vector.shape_cast %26 : vector<1x128x128xbf16> to vector<128x128xbf16>
    %cst_16 = arith.constant dense<0.000000e+00> : vector<8x128xf32>
    %28 = tpu.matmul %25, %27, %cst_16 {dimension_numbers = #tpu.dot_dimension_numbers<[1], [0], [0], [1], [0, 0, 1, 1], [], []>} : vector<8x128xbf16>, vector<128x128xbf16>, vector<8x128xf32> -> vector<8x128xf32>
    %c1_17 = arith.constant 1 : index
    %c0_18 = arith.constant 0 : index
    %29 = vector.load %arg6[%c1_17, %c0_18] : memref<27x128xf32, #tpu.memory_space<vmem>>, vector<1x128xf32>
    %30 = vector.broadcast %29 : vector<1x128xf32> to vector<8x128xf32>
    %31 = arith.addf %28, %30 : vector<8x128xf32>
    %cst_19 = arith.constant 5.000000e-01 : f32
    %32 = vector.broadcast %cst_19 : f32 to vector<8x128xf32>
    %33 = arith.mulf %32, %31 : vector<8x128xf32>
    %34 = arith.mulf %31, %31 : vector<8x128xf32>
    %35 = arith.mulf %34, %31 : vector<8x128xf32>
    %cst_20 = arith.constant 4.471500e-02 : f32
    %36 = vector.broadcast %cst_20 : f32 to vector<8x128xf32>
    %37 = arith.mulf %36, %35 : vector<8x128xf32>
    %38 = arith.addf %31, %37 : vector<8x128xf32>
    %cst_21 = arith.constant 0.797884583 : f32
    %39 = vector.broadcast %cst_21 : f32 to vector<8x128xf32>
    %40 = arith.mulf %39, %38 : vector<8x128xf32>
    %41 = math.tanh %40 : vector<8x128xf32>
    %cst_22 = arith.constant 1.000000e+00 : f32
    %42 = vector.broadcast %cst_22 : f32 to vector<8x128xf32>
    %43 = arith.addf %42, %41 : vector<8x128xf32>
    %44 = arith.mulf %33, %43 : vector<8x128xf32>
    %45 = arith.truncf %44 : vector<8x128xf32> to vector<8x128xbf16>
    %46 = arith.addf %1, %45 : vector<8x128xbf16>
    %cst_23 = arith.constant 1.414060e+00 : bf16
    %47 = vector.broadcast %cst_23 : bf16 to vector<8x128xbf16>
    %48 = arith.divf %46, %47 : vector<8x128xbf16>
    %c2 = arith.constant 2 : index
    %c0_24 = arith.constant 0 : index
    %c0_25 = arith.constant 0 : index
    %49 = vector.load %arg4[%c2, %c0_24, %c0_25] : memref<26x128x128xbf16, #tpu.memory_space<vmem>>, vector<1x128x128xbf16>
    %50 = vector.shape_cast %49 : vector<1x128x128xbf16> to vector<128x128xbf16>
    %cst_26 = arith.constant dense<0.000000e+00> : vector<8x128xf32>
    %51 = tpu.matmul %48, %50, %cst_26 {dimension_numbers = #tpu.dot_dimension_numbers<[1], [0], [0], [1], [0, 0, 1, 1], [], []>} : vector<8x128xbf16>, vector<128x128xbf16>, vector<8x128xf32> -> vector<8x128xf32>
    %c2_27 = arith.constant 2 : index
    %c0_28 = arith.constant 0 : index
    %52 = vector.load %arg6[%c2_27, %c0_28] : memref<27x128xf32, #tpu.memory_space<vmem>>, vector<1x128xf32>
    %53 = vector.broadcast %52 : vector<1x128xf32> to vector<8x128xf32>
    %54 = arith.addf %51, %53 : vector<8x128xf32>
    %cst_29 = arith.constant 5.000000e-01 : f32
    %55 = vector.broadcast %cst_29 : f32 to vector<8x128xf32>
    %56 = arith.mulf %55, %54 : vector<8x128xf32>
    %57 = arith.mulf %54, %54 : vector<8x128xf32>
    %58 = arith.mulf %57, %54 : vector<8x128xf32>
    %cst_30 = arith.constant 4.471500e-02 : f32
    %59 = vector.broadcast %cst_30 : f32 to vector<8x128xf32>
    %60 = arith.mulf %59, %58 : vector<8x128xf32>
    %61 = arith.addf %54, %60 : vector<8x128xf32>
    %cst_31 = arith.constant 0.797884583 : f32
    %62 = vector.broadcast %cst_31 : f32 to vector<8x128xf32>
    %63 = arith.mulf %62, %61 : vector<8x128xf32>
    %64 = math.tanh %63 : vector<8x128xf32>
    %cst_32 = arith.constant 1.000000e+00 : f32
    %65 = vector.broadcast %cst_32 : f32 to vector<8x128xf32>
    %66 = arith.addf %65, %64 : vector<8x128xf32>
    %67 = arith.mulf %56, %66 : vector<8x128xf32>
    %68 = arith.truncf %67 : vector<8x128xf32> to vector<8x128xbf16>
    %c3 = arith.constant 3 : index
    %c0_33 = arith.constant 0 : index
    %c0_34 = arith.constant 0 : index
    %69 = vector.load %arg4[%c3, %c0_33, %c0_34] : memref<26x128x128xbf16, #tpu.memory_space<vmem>>, vector<1x128x128xbf16>
    %70 = vector.shape_cast %69 : vector<1x128x128xbf16> to vector<128x128xbf16>
    %cst_35 = arith.constant dense<0.000000e+00> : vector<8x128xf32>
    %71 = tpu.matmul %68, %70, %cst_35 {dimension_numbers = #tpu.dot_dimension_numbers<[1], [0], [0], [1], [0, 0, 1, 1], [], []>} : vector<8x128xbf16>, vector<128x128xbf16>, vector<8x128xf32> -> vector<8x128xf32>
    %c3_36 = arith.constant 3 : index
    %c0_37 = arith.constant 0 : index
    %72 = vector.load %arg6[%c3_36, %c0_37] : memref<27x128xf32, #tpu.memory_space<vmem>>, vector<1x128xf32>
    %73 = vector.broadcast %72 : vector<1x128xf32> to vector<8x128xf32>
    %74 = arith.addf %71, %73 : vector<8x128xf32>
    %cst_38 = arith.constant 5.000000e-01 : f32
    %75 = vector.broadcast %cst_38 : f32 to vector<8x128xf32>
    %76 = arith.mulf %75, %74 : vector<8x128xf32>
    %77 = arith.mulf %74, %74 : vector<8x128xf32>
    %78 = arith.mulf %77, %74 : vector<8x128xf32>
    %cst_39 = arith.constant 4.471500e-02 : f32
    %79 = vector.broadcast %cst_39 : f32 to vector<8x128xf32>
    %80 = arith.mulf %79, %78 : vector<8x128xf32>
    %81 = arith.addf %74, %80 : vector<8x128xf32>
    %cst_40 = arith.constant 0.797884583 : f32
    %82 = vector.broadcast %cst_40 : f32 to vector<8x128xf32>
    %83 = arith.mulf %82, %81 : vector<8x128xf32>
    %84 = math.tanh %83 : vector<8x128xf32>
    %cst_41 = arith.constant 1.000000e+00 : f32
    %85 = vector.broadcast %cst_41 : f32 to vector<8x128xf32>
    %86 = arith.addf %85, %84 : vector<8x128xf32>
    %87 = arith.mulf %76, %86 : vector<8x128xf32>
    %88 = arith.truncf %87 : vector<8x128xf32> to vector<8x128xbf16>
    %c4 = arith.constant 4 : index
    %c0_42 = arith.constant 0 : index
    %c0_43 = arith.constant 0 : index
    %89 = vector.load %arg4[%c4, %c0_42, %c0_43] : memref<26x128x128xbf16, #tpu.memory_space<vmem>>, vector<1x128x128xbf16>
    %90 = vector.shape_cast %89 : vector<1x128x128xbf16> to vector<128x128xbf16>
    %cst_44 = arith.constant dense<0.000000e+00> : vector<8x128xf32>
    %91 = tpu.matmul %88, %90, %cst_44 {dimension_numbers = #tpu.dot_dimension_numbers<[1], [0], [0], [1], [0, 0, 1, 1], [], []>} : vector<8x128xbf16>, vector<128x128xbf16>, vector<8x128xf32> -> vector<8x128xf32>
    %c4_45 = arith.constant 4 : index
    %c0_46 = arith.constant 0 : index
    %92 = vector.load %arg6[%c4_45, %c0_46] : memref<27x128xf32, #tpu.memory_space<vmem>>, vector<1x128xf32>
    %93 = vector.broadcast %92 : vector<1x128xf32> to vector<8x128xf32>
    %94 = arith.addf %91, %93 : vector<8x128xf32>
    %cst_47 = arith.constant 5.000000e-01 : f32
    %95 = vector.broadcast %cst_47 : f32 to vector<8x128xf32>
    %96 = arith.mulf %95, %94 : vector<8x128xf32>
    %97 = arith.mulf %94, %94 : vector<8x128xf32>
    %98 = arith.mulf %97, %94 : vector<8x128xf32>
    %cst_48 = arith.constant 4.471500e-02 : f32
    %99 = vector.broadcast %cst_48 : f32 to vector<8x128xf32>
    %100 = arith.mulf %99, %98 : vector<8x128xf32>
    %101 = arith.addf %94, %100 : vector<8x128xf32>
    %cst_49 = arith.constant 0.797884583 : f32
    %102 = vector.broadcast %cst_49 : f32 to vector<8x128xf32>
    %103 = arith.mulf %102, %101 : vector<8x128xf32>
    %104 = math.tanh %103 : vector<8x128xf32>
    %cst_50 = arith.constant 1.000000e+00 : f32
    %105 = vector.broadcast %cst_50 : f32 to vector<8x128xf32>
    %106 = arith.addf %105, %104 : vector<8x128xf32>
    %107 = arith.mulf %96, %106 : vector<8x128xf32>
    %108 = arith.truncf %107 : vector<8x128xf32> to vector<8x128xbf16>
    %c5 = arith.constant 5 : index
    %c0_51 = arith.constant 0 : index
    %c0_52 = arith.constant 0 : index
    %109 = vector.load %arg4[%c5, %c0_51, %c0_52] : memref<26x128x128xbf16, #tpu.memory_space<vmem>>, vector<1x128x128xbf16>
    %110 = vector.shape_cast %109 : vector<1x128x128xbf16> to vector<128x128xbf16>
    %cst_53 = arith.constant dense<0.000000e+00> : vector<8x128xf32>
    %111 = tpu.matmul %108, %110, %cst_53 {dimension_numbers = #tpu.dot_dimension_numbers<[1], [0], [0], [1], [0, 0, 1, 1], [], []>} : vector<8x128xbf16>, vector<128x128xbf16>, vector<8x128xf32> -> vector<8x128xf32>
    %c5_54 = arith.constant 5 : index
    %c0_55 = arith.constant 0 : index
    %112 = vector.load %arg6[%c5_54, %c0_55] : memref<27x128xf32, #tpu.memory_space<vmem>>, vector<1x128xf32>
    %113 = vector.broadcast %112 : vector<1x128xf32> to vector<8x128xf32>
    %114 = arith.addf %111, %113 : vector<8x128xf32>
    %cst_56 = arith.constant 5.000000e-01 : f32
    %115 = vector.broadcast %cst_56 : f32 to vector<8x128xf32>
    %116 = arith.mulf %115, %114 : vector<8x128xf32>
    %117 = arith.mulf %114, %114 : vector<8x128xf32>
    %118 = arith.mulf %117, %114 : vector<8x128xf32>
    %cst_57 = arith.constant 4.471500e-02 : f32
    %119 = vector.broadcast %cst_57 : f32 to vector<8x128xf32>
    %120 = arith.mulf %119, %118 : vector<8x128xf32>
    %121 = arith.addf %114, %120 : vector<8x128xf32>
    %cst_58 = arith.constant 0.797884583 : f32
    %122 = vector.broadcast %cst_58 : f32 to vector<8x128xf32>
    %123 = arith.mulf %122, %121 : vector<8x128xf32>
    %124 = math.tanh %123 : vector<8x128xf32>
    %cst_59 = arith.constant 1.000000e+00 : f32
    %125 = vector.broadcast %cst_59 : f32 to vector<8x128xf32>
    %126 = arith.addf %125, %124 : vector<8x128xf32>
    %127 = arith.mulf %116, %126 : vector<8x128xf32>
    %128 = arith.truncf %127 : vector<8x128xf32> to vector<8x128xbf16>
    %c0_60 = arith.constant 0 : index
    %c0_61 = arith.constant 0 : index
    %c0_62 = arith.constant 0 : index
    %129 = vector.load %arg5[%c0_60, %c0_61, %c0_62] : memref<2x128x256xbf16, #tpu.memory_space<vmem>>, vector<1x128x256xbf16>
    %130 = vector.shape_cast %129 : vector<1x128x256xbf16> to vector<128x256xbf16>
    %cst_63 = arith.constant dense<0.000000e+00> : vector<8x256xf32>
    %131 = tpu.matmul %5, %130, %cst_63 {dimension_numbers = #tpu.dot_dimension_numbers<[1], [0], [0], [1], [0, 0, 1, 1], [], []>} : vector<8x128xbf16>, vector<128x256xbf16>, vector<8x256xf32> -> vector<8x256xf32>
    %132 = vector.extract_strided_slice %131 {offsets = [0, 0], sizes = [8, 128], strides = [1, 1]} : vector<8x256xf32> to vector<8x128xf32>
    %c6 = arith.constant 6 : index
    %c0_64 = arith.constant 0 : index
    %133 = vector.load %arg6[%c6, %c0_64] : memref<27x128xf32, #tpu.memory_space<vmem>>, vector<1x128xf32>
    %134 = vector.broadcast %133 : vector<1x128xf32> to vector<8x128xf32>
    %135 = arith.addf %132, %134 : vector<8x128xf32>
    %136 = vector.extract_strided_slice %131 {offsets = [0, 128], sizes = [8, 128], strides = [1, 1]} : vector<8x256xf32> to vector<8x128xf32>
    %c7 = arith.constant 7 : index
    %c0_65 = arith.constant 0 : index
    %137 = vector.load %arg6[%c7, %c0_65] : memref<27x128xf32, #tpu.memory_space<vmem>>, vector<1x128xf32>
    %138 = vector.broadcast %137 : vector<1x128xf32> to vector<8x128xf32>
    %139 = arith.addf %136, %138 : vector<8x128xf32>
    %cst_66 = arith.constant 5.000000e-01 : f32
    %140 = vector.broadcast %cst_66 : f32 to vector<8x128xf32>
    %141 = arith.mulf %140, %135 : vector<8x128xf32>
    %142 = arith.mulf %135, %135 : vector<8x128xf32>
    %143 = arith.mulf %142, %135 : vector<8x128xf32>
    %cst_67 = arith.constant 4.471500e-02 : f32
    %144 = vector.broadcast %cst_67 : f32 to vector<8x128xf32>
    %145 = arith.mulf %144, %143 : vector<8x128xf32>
    %146 = arith.addf %135, %145 : vector<8x128xf32>
    %cst_68 = arith.constant 0.797884583 : f32
    %147 = vector.broadcast %cst_68 : f32 to vector<8x128xf32>
    %148 = arith.mulf %147, %146 : vector<8x128xf32>
    %149 = math.tanh %148 : vector<8x128xf32>
    %cst_69 = arith.constant 1.000000e+00 : f32
    %150 = vector.broadcast %cst_69 : f32 to vector<8x128xf32>
    %151 = arith.addf %150, %149 : vector<8x128xf32>
    %152 = arith.mulf %141, %151 : vector<8x128xf32>
    %153 = arith.truncf %152 : vector<8x128xf32> to vector<8x128xbf16>
    %c6_70 = arith.constant 6 : index
    %c0_71 = arith.constant 0 : index
    %c0_72 = arith.constant 0 : index
    %154 = vector.load %arg4[%c6_70, %c0_71, %c0_72] : memref<26x128x128xbf16, #tpu.memory_space<vmem>>, vector<1x128x128xbf16>
    %155 = vector.shape_cast %154 : vector<1x128x128xbf16> to vector<128x128xbf16>
    %cst_73 = arith.constant dense<0.000000e+00> : vector<8x128xf32>
    %156 = tpu.matmul %153, %155, %cst_73 {dimension_numbers = #tpu.dot_dimension_numbers<[1], [0], [0], [1], [0, 0, 1, 1], [], []>} : vector<8x128xbf16>, vector<128x128xbf16>, vector<8x128xf32> -> vector<8x128xf32>
    %c8 = arith.constant 8 : index
    %c0_74 = arith.constant 0 : index
    %157 = vector.load %arg6[%c8, %c0_74] : memref<27x128xf32, #tpu.memory_space<vmem>>, vector<1x128xf32>
    %158 = vector.broadcast %157 : vector<1x128xf32> to vector<8x128xf32>
    %159 = arith.addf %156, %158 : vector<8x128xf32>
    %160 = arith.truncf %159 : vector<8x128xf32> to vector<8x128xbf16>
    %cst_75 = arith.constant 5.000000e-01 : f32
    %161 = vector.broadcast %cst_75 : f32 to vector<8x128xf32>
    %162 = arith.mulf %161, %139 : vector<8x128xf32>
    %163 = arith.mulf %139, %139 : vector<8x128xf32>
    %164 = arith.mulf %163, %139 : vector<8x128xf32>
    %cst_76 = arith.constant 4.471500e-02 : f32
    %165 = vector.broadcast %cst_76 : f32 to vector<8x128xf32>
    %166 = arith.mulf %165, %164 : vector<8x128xf32>
    %167 = arith.addf %139, %166 : vector<8x128xf32>
    %cst_77 = arith.constant 0.797884583 : f32
    %168 = vector.broadcast %cst_77 : f32 to vector<8x128xf32>
    %169 = arith.mulf %168, %167 : vector<8x128xf32>
    %170 = math.tanh %169 : vector<8x128xf32>
    %cst_78 = arith.constant 1.000000e+00 : f32
    %171 = vector.broadcast %cst_78 : f32 to vector<8x128xf32>
    %172 = arith.addf %171, %170 : vector<8x128xf32>
    %173 = arith.mulf %162, %172 : vector<8x128xf32>
    %174 = arith.truncf %173 : vector<8x128xf32> to vector<8x128xbf16>
    %c7_79 = arith.constant 7 : index
    %c0_80 = arith.constant 0 : index
    %c0_81 = arith.constant 0 : index
    %175 = vector.load %arg4[%c7_79, %c0_80, %c0_81] : memref<26x128x128xbf16, #tpu.memory_space<vmem>>, vector<1x128x128xbf16>
    %176 = vector.shape_cast %175 : vector<1x128x128xbf16> to vector<128x128xbf16>
    %cst_82 = arith.constant dense<0.000000e+00> : vector<8x128xf32>
    %177 = tpu.matmul %174, %176, %cst_82 {dimension_numbers = #tpu.dot_dimension_numbers<[1], [0], [0], [1], [0, 0, 1, 1], [], []>} : vector<8x128xbf16>, vector<128x128xbf16>, vector<8x128xf32> -> vector<8x128xf32>
    %c9 = arith.constant 9 : index
    %c0_83 = arith.constant 0 : index
    %178 = vector.load %arg6[%c9, %c0_83] : memref<27x128xf32, #tpu.memory_space<vmem>>, vector<1x128xf32>
    %179 = vector.broadcast %178 : vector<1x128xf32> to vector<8x128xf32>
    %180 = arith.addf %177, %179 : vector<8x128xf32>
    %181 = arith.truncf %180 : vector<8x128xf32> to vector<8x128xbf16>
    %c1_84 = arith.constant 1 : index
    %c0_85 = arith.constant 0 : index
    %c0_86 = arith.constant 0 : index
    %182 = vector.load %arg5[%c1_84, %c0_85, %c0_86] : memref<2x128x256xbf16, #tpu.memory_space<vmem>>, vector<1x128x256xbf16>
    %183 = vector.shape_cast %182 : vector<1x128x256xbf16> to vector<128x256xbf16>
    %cst_87 = arith.constant dense<0.000000e+00> : vector<8x256xf32>
    %184 = tpu.matmul %3, %183, %cst_87 {dimension_numbers = #tpu.dot_dimension_numbers<[1], [0], [0], [1], [0, 0, 1, 1], [], []>} : vector<8x128xbf16>, vector<128x256xbf16>, vector<8x256xf32> -> vector<8x256xf32>
    %185 = vector.extract_strided_slice %184 {offsets = [0, 0], sizes = [8, 128], strides = [1, 1]} : vector<8x256xf32> to vector<8x128xf32>
    %c10 = arith.constant 10 : index
    %c0_88 = arith.constant 0 : index
    %186 = vector.load %arg6[%c10, %c0_88] : memref<27x128xf32, #tpu.memory_space<vmem>>, vector<1x128xf32>
    %187 = vector.broadcast %186 : vector<1x128xf32> to vector<8x128xf32>
    %188 = arith.addf %185, %187 : vector<8x128xf32>
    %189 = vector.extract_strided_slice %184 {offsets = [0, 128], sizes = [8, 128], strides = [1, 1]} : vector<8x256xf32> to vector<8x128xf32>
    %c11 = arith.constant 11 : index
    %c0_89 = arith.constant 0 : index
    %190 = vector.load %arg6[%c11, %c0_89] : memref<27x128xf32, #tpu.memory_space<vmem>>, vector<1x128xf32>
    %191 = vector.broadcast %190 : vector<1x128xf32> to vector<8x128xf32>
    %192 = arith.addf %189, %191 : vector<8x128xf32>
    %cst_90 = arith.constant 5.000000e-01 : f32
    %193 = vector.broadcast %cst_90 : f32 to vector<8x128xf32>
    %194 = arith.mulf %193, %188 : vector<8x128xf32>
    %195 = arith.mulf %188, %188 : vector<8x128xf32>
    %196 = arith.mulf %195, %188 : vector<8x128xf32>
    %cst_91 = arith.constant 4.471500e-02 : f32
    %197 = vector.broadcast %cst_91 : f32 to vector<8x128xf32>
    %198 = arith.mulf %197, %196 : vector<8x128xf32>
    %199 = arith.addf %188, %198 : vector<8x128xf32>
    %cst_92 = arith.constant 0.797884583 : f32
    %200 = vector.broadcast %cst_92 : f32 to vector<8x128xf32>
    %201 = arith.mulf %200, %199 : vector<8x128xf32>
    %202 = math.tanh %201 : vector<8x128xf32>
    %cst_93 = arith.constant 1.000000e+00 : f32
    %203 = vector.broadcast %cst_93 : f32 to vector<8x128xf32>
    %204 = arith.addf %203, %202 : vector<8x128xf32>
    %205 = arith.mulf %194, %204 : vector<8x128xf32>
    %206 = arith.truncf %205 : vector<8x128xf32> to vector<8x128xbf16>
    %c8_94 = arith.constant 8 : index
    %c0_95 = arith.constant 0 : index
    %c0_96 = arith.constant 0 : index
    %207 = vector.load %arg4[%c8_94, %c0_95, %c0_96] : memref<26x128x128xbf16, #tpu.memory_space<vmem>>, vector<1x128x128xbf16>
    %208 = vector.shape_cast %207 : vector<1x128x128xbf16> to vector<128x128xbf16>
    %cst_97 = arith.constant dense<0.000000e+00> : vector<8x128xf32>
    %209 = tpu.matmul %206, %208, %cst_97 {dimension_numbers = #tpu.dot_dimension_numbers<[1], [0], [0], [1], [0, 0, 1, 1], [], []>} : vector<8x128xbf16>, vector<128x128xbf16>, vector<8x128xf32> -> vector<8x128xf32>
    %c12 = arith.constant 12 : index
    %c0_98 = arith.constant 0 : index
    %210 = vector.load %arg6[%c12, %c0_98] : memref<27x128xf32, #tpu.memory_space<vmem>>, vector<1x128xf32>
    %211 = vector.broadcast %210 : vector<1x128xf32> to vector<8x128xf32>
    %212 = arith.addf %209, %211 : vector<8x128xf32>
    %213 = arith.truncf %212 : vector<8x128xf32> to vector<8x128xbf16>
    %cst_99 = arith.constant 5.000000e-01 : f32
    %214 = vector.broadcast %cst_99 : f32 to vector<8x128xf32>
    %215 = arith.mulf %214, %192 : vector<8x128xf32>
    %216 = arith.mulf %192, %192 : vector<8x128xf32>
    %217 = arith.mulf %216, %192 : vector<8x128xf32>
    %cst_100 = arith.constant 4.471500e-02 : f32
    %218 = vector.broadcast %cst_100 : f32 to vector<8x128xf32>
    %219 = arith.mulf %218, %217 : vector<8x128xf32>
    %220 = arith.addf %192, %219 : vector<8x128xf32>
    %cst_101 = arith.constant 0.797884583 : f32
    %221 = vector.broadcast %cst_101 : f32 to vector<8x128xf32>
    %222 = arith.mulf %221, %220 : vector<8x128xf32>
    %223 = math.tanh %222 : vector<8x128xf32>
    %cst_102 = arith.constant 1.000000e+00 : f32
    %224 = vector.broadcast %cst_102 : f32 to vector<8x128xf32>
    %225 = arith.addf %224, %223 : vector<8x128xf32>
    %226 = arith.mulf %215, %225 : vector<8x128xf32>
    %227 = arith.truncf %226 : vector<8x128xf32> to vector<8x128xbf16>
    %c9_103 = arith.constant 9 : index
    %c0_104 = arith.constant 0 : index
    %c0_105 = arith.constant 0 : index
    %228 = vector.load %arg4[%c9_103, %c0_104, %c0_105] : memref<26x128x128xbf16, #tpu.memory_space<vmem>>, vector<1x128x128xbf16>
    %229 = vector.shape_cast %228 : vector<1x128x128xbf16> to vector<128x128xbf16>
    %cst_106 = arith.constant dense<0.000000e+00> : vector<8x128xf32>
    %230 = tpu.matmul %227, %229, %cst_106 {dimension_numbers = #tpu.dot_dimension_numbers<[1], [0], [0], [1], [0, 0, 1, 1], [], []>} : vector<8x128xbf16>, vector<128x128xbf16>, vector<8x128xf32> -> vector<8x128xf32>
    %c13 = arith.constant 13 : index
    %c0_107 = arith.constant 0 : index
    %231 = vector.load %arg6[%c13, %c0_107] : memref<27x128xf32, #tpu.memory_space<vmem>>, vector<1x128xf32>
    %232 = vector.broadcast %231 : vector<1x128xf32> to vector<8x128xf32>
    %233 = arith.addf %230, %232 : vector<8x128xf32>
    %234 = arith.truncf %233 : vector<8x128xf32> to vector<8x128xbf16>
    %c10_108 = arith.constant 10 : index
    %c0_109 = arith.constant 0 : index
    %c0_110 = arith.constant 0 : index
    %235 = vector.load %arg4[%c10_108, %c0_109, %c0_110] : memref<26x128x128xbf16, #tpu.memory_space<vmem>>, vector<1x128x128xbf16>
    %236 = vector.shape_cast %235 : vector<1x128x128xbf16> to vector<128x128xbf16>
    %cst_111 = arith.constant dense<0.000000e+00> : vector<8x128xf32>
    %237 = tpu.matmul %128, %236, %cst_111 {dimension_numbers = #tpu.dot_dimension_numbers<[1], [0], [0], [1], [0, 0, 1, 1], [], []>} : vector<8x128xbf16>, vector<128x128xbf16>, vector<8x128xf32> -> vector<8x128xf32>
    %c14 = arith.constant 14 : index
    %c0_112 = arith.constant 0 : index
    %238 = vector.load %arg6[%c14, %c0_112] : memref<27x128xf32, #tpu.memory_space<vmem>>, vector<1x128xf32>
    %239 = vector.broadcast %238 : vector<1x128xf32> to vector<8x128xf32>
    %240 = arith.addf %237, %239 : vector<8x128xf32>
    %cst_113 = arith.constant 0.000000e+00 : f32
    %241 = vector.broadcast %cst_113 : f32 to vector<8x128xf32>
    %242 = arith.maximumf %240, %241 : vector<8x128xf32>
    %243 = arith.truncf %242 : vector<8x128xf32> to vector<8x128xbf16>
    %244 = arith.mulf %213, %243 : vector<8x128xbf16>
    %245 = arith.addf %244, %160 : vector<8x128xbf16>
    %c11_114 = arith.constant 11 : index
    %c0_115 = arith.constant 0 : index
    %c0_116 = arith.constant 0 : index
    %246 = vector.load %arg4[%c11_114, %c0_115, %c0_116] : memref<26x128x128xbf16, #tpu.memory_space<vmem>>, vector<1x128x128xbf16>
    %247 = vector.shape_cast %246 : vector<1x128x128xbf16> to vector<128x128xbf16>
    %cst_117 = arith.constant dense<0.000000e+00> : vector<8x128xf32>
    %248 = tpu.matmul %245, %247, %cst_117 {dimension_numbers = #tpu.dot_dimension_numbers<[1], [0], [0], [1], [0, 0, 1, 1], [], []>} : vector<8x128xbf16>, vector<128x128xbf16>, vector<8x128xf32> -> vector<8x128xf32>
    %c12_118 = arith.constant 12 : index
    %c0_119 = arith.constant 0 : index
    %c0_120 = arith.constant 0 : index
    %249 = vector.load %arg4[%c12_118, %c0_119, %c0_120] : memref<26x128x128xbf16, #tpu.memory_space<vmem>>, vector<1x128x128xbf16>
    %250 = vector.shape_cast %249 : vector<1x128x128xbf16> to vector<128x128xbf16>
    %cst_121 = arith.constant dense<0.000000e+00> : vector<8x128xf32>
    %251 = tpu.matmul %128, %250, %cst_121 {dimension_numbers = #tpu.dot_dimension_numbers<[1], [0], [0], [1], [0, 0, 1, 1], [], []>} : vector<8x128xbf16>, vector<128x128xbf16>, vector<8x128xf32> -> vector<8x128xf32>
    %252 = arith.addf %248, %251 : vector<8x128xf32>
    %c15 = arith.constant 15 : index
    %c0_122 = arith.constant 0 : index
    %253 = vector.load %arg6[%c15, %c0_122] : memref<27x128xf32, #tpu.memory_space<vmem>>, vector<1x128xf32>
    %254 = vector.broadcast %253 : vector<1x128xf32> to vector<8x128xf32>
    %255 = arith.addf %252, %254 : vector<8x128xf32>
    %256 = arith.truncf %255 : vector<8x128xf32> to vector<8x128xbf16>
    %c13_123 = arith.constant 13 : index
    %c0_124 = arith.constant 0 : index
    %c0_125 = arith.constant 0 : index
    %257 = vector.load %arg4[%c13_123, %c0_124, %c0_125] : memref<26x128x128xbf16, #tpu.memory_space<vmem>>, vector<1x128x128xbf16>
    %258 = vector.shape_cast %257 : vector<1x128x128xbf16> to vector<128x128xbf16>
    %cst_126 = arith.constant dense<0.000000e+00> : vector<8x128xf32>
    %259 = tpu.matmul %256, %258, %cst_126 {dimension_numbers = #tpu.dot_dimension_numbers<[1], [0], [0], [1], [0, 0, 1, 1], [], []>} : vector<8x128xbf16>, vector<128x128xbf16>, vector<8x128xf32> -> vector<8x128xf32>
    %c16 = arith.constant 16 : index
    %c0_127 = arith.constant 0 : index
    %260 = vector.load %arg6[%c16, %c0_127] : memref<27x128xf32, #tpu.memory_space<vmem>>, vector<1x128xf32>
    %261 = vector.broadcast %260 : vector<1x128xf32> to vector<8x128xf32>
    %262 = arith.addf %259, %261 : vector<8x128xf32>
    %cst_128 = arith.constant 5.000000e-01 : f32
    %263 = vector.broadcast %cst_128 : f32 to vector<8x128xf32>
    %264 = arith.mulf %263, %262 : vector<8x128xf32>
    %265 = arith.mulf %262, %262 : vector<8x128xf32>
    %266 = arith.mulf %265, %262 : vector<8x128xf32>
    %cst_129 = arith.constant 4.471500e-02 : f32
    %267 = vector.broadcast %cst_129 : f32 to vector<8x128xf32>
    %268 = arith.mulf %267, %266 : vector<8x128xf32>
    %269 = arith.addf %262, %268 : vector<8x128xf32>
    %cst_130 = arith.constant 0.797884583 : f32
    %270 = vector.broadcast %cst_130 : f32 to vector<8x128xf32>
    %271 = arith.mulf %270, %269 : vector<8x128xf32>
    %272 = math.tanh %271 : vector<8x128xf32>
    %cst_131 = arith.constant 1.000000e+00 : f32
    %273 = vector.broadcast %cst_131 : f32 to vector<8x128xf32>
    %274 = arith.addf %273, %272 : vector<8x128xf32>
    %275 = arith.mulf %264, %274 : vector<8x128xf32>
    %276 = arith.truncf %275 : vector<8x128xf32> to vector<8x128xbf16>
    %c14_132 = arith.constant 14 : index
    %c0_133 = arith.constant 0 : index
    %c0_134 = arith.constant 0 : index
    %277 = vector.load %arg4[%c14_132, %c0_133, %c0_134] : memref<26x128x128xbf16, #tpu.memory_space<vmem>>, vector<1x128x128xbf16>
    %278 = vector.shape_cast %277 : vector<1x128x128xbf16> to vector<128x128xbf16>
    %cst_135 = arith.constant dense<0.000000e+00> : vector<8x128xf32>
    %279 = tpu.matmul %276, %278, %cst_135 {dimension_numbers = #tpu.dot_dimension_numbers<[1], [0], [0], [1], [0, 0, 1, 1], [], []>} : vector<8x128xbf16>, vector<128x128xbf16>, vector<8x128xf32> -> vector<8x128xf32>
    %c17 = arith.constant 17 : index
    %c0_136 = arith.constant 0 : index
    %280 = vector.load %arg6[%c17, %c0_136] : memref<27x128xf32, #tpu.memory_space<vmem>>, vector<1x128xf32>
    %281 = vector.broadcast %280 : vector<1x128xf32> to vector<8x128xf32>
    %282 = arith.addf %279, %281 : vector<8x128xf32>
    %cst_137 = arith.constant 5.000000e-01 : f32
    %283 = vector.broadcast %cst_137 : f32 to vector<8x128xf32>
    %284 = arith.mulf %283, %282 : vector<8x128xf32>
    %285 = arith.mulf %282, %282 : vector<8x128xf32>
    %286 = arith.mulf %285, %282 : vector<8x128xf32>
    %cst_138 = arith.constant 4.471500e-02 : f32
    %287 = vector.broadcast %cst_138 : f32 to vector<8x128xf32>
    %288 = arith.mulf %287, %286 : vector<8x128xf32>
    %289 = arith.addf %282, %288 : vector<8x128xf32>
    %cst_139 = arith.constant 0.797884583 : f32
    %290 = vector.broadcast %cst_139 : f32 to vector<8x128xf32>
    %291 = arith.mulf %290, %289 : vector<8x128xf32>
    %292 = math.tanh %291 : vector<8x128xf32>
    %cst_140 = arith.constant 1.000000e+00 : f32
    %293 = vector.broadcast %cst_140 : f32 to vector<8x128xf32>
    %294 = arith.addf %293, %292 : vector<8x128xf32>
    %295 = arith.mulf %284, %294 : vector<8x128xf32>
    %296 = arith.truncf %295 : vector<8x128xf32> to vector<8x128xbf16>
    %c15_141 = arith.constant 15 : index
    %c0_142 = arith.constant 0 : index
    %c0_143 = arith.constant 0 : index
    %297 = vector.load %arg4[%c15_141, %c0_142, %c0_143] : memref<26x128x128xbf16, #tpu.memory_space<vmem>>, vector<1x128x128xbf16>
    %298 = vector.shape_cast %297 : vector<1x128x128xbf16> to vector<128x128xbf16>
    %cst_144 = arith.constant dense<0.000000e+00> : vector<8x128xf32>
    %299 = tpu.matmul %296, %298, %cst_144 {dimension_numbers = #tpu.dot_dimension_numbers<[1], [0], [0], [1], [0, 0, 1, 1], [], []>} : vector<8x128xbf16>, vector<128x128xbf16>, vector<8x128xf32> -> vector<8x128xf32>
    %c18 = arith.constant 18 : index
    %c0_145 = arith.constant 0 : index
    %300 = vector.load %arg6[%c18, %c0_145] : memref<27x128xf32, #tpu.memory_space<vmem>>, vector<1x128xf32>
    %301 = vector.broadcast %300 : vector<1x128xf32> to vector<8x128xf32>
    %302 = arith.addf %299, %301 : vector<8x128xf32>
    %cst_146 = arith.constant 5.000000e-01 : f32
    %303 = vector.broadcast %cst_146 : f32 to vector<8x128xf32>
    %304 = arith.mulf %303, %302 : vector<8x128xf32>
    %305 = arith.mulf %302, %302 : vector<8x128xf32>
    %306 = arith.mulf %305, %302 : vector<8x128xf32>
    %cst_147 = arith.constant 4.471500e-02 : f32
    %307 = vector.broadcast %cst_147 : f32 to vector<8x128xf32>
    %308 = arith.mulf %307, %306 : vector<8x128xf32>
    %309 = arith.addf %302, %308 : vector<8x128xf32>
    %cst_148 = arith.constant 0.797884583 : f32
    %310 = vector.broadcast %cst_148 : f32 to vector<8x128xf32>
    %311 = arith.mulf %310, %309 : vector<8x128xf32>
    %312 = math.tanh %311 : vector<8x128xf32>
    %cst_149 = arith.constant 1.000000e+00 : f32
    %313 = vector.broadcast %cst_149 : f32 to vector<8x128xf32>
    %314 = arith.addf %313, %312 : vector<8x128xf32>
    %315 = arith.mulf %304, %314 : vector<8x128xf32>
    %316 = arith.truncf %315 : vector<8x128xf32> to vector<8x128xbf16>
    %c16_150 = arith.constant 16 : index
    %c0_151 = arith.constant 0 : index
    %c0_152 = arith.constant 0 : index
    %317 = vector.load %arg4[%c16_150, %c0_151, %c0_152] : memref<26x128x128xbf16, #tpu.memory_space<vmem>>, vector<1x128x128xbf16>
    %318 = vector.shape_cast %317 : vector<1x128x128xbf16> to vector<128x128xbf16>
    %cst_153 = arith.constant dense<0.000000e+00> : vector<8x128xf32>
    %319 = tpu.matmul %316, %318, %cst_153 {dimension_numbers = #tpu.dot_dimension_numbers<[1], [0], [0], [1], [0, 0, 1, 1], [], []>} : vector<8x128xbf16>, vector<128x128xbf16>, vector<8x128xf32> -> vector<8x128xf32>
    %c19 = arith.constant 19 : index
    %c0_154 = arith.constant 0 : index
    %320 = vector.load %arg6[%c19, %c0_154] : memref<27x128xf32, #tpu.memory_space<vmem>>, vector<1x128xf32>
    %321 = vector.broadcast %320 : vector<1x128xf32> to vector<8x128xf32>
    %322 = arith.addf %319, %321 : vector<8x128xf32>
    %cst_155 = arith.constant 5.000000e-01 : f32
    %323 = vector.broadcast %cst_155 : f32 to vector<8x128xf32>
    %324 = arith.mulf %323, %322 : vector<8x128xf32>
    %325 = arith.mulf %322, %322 : vector<8x128xf32>
    %326 = arith.mulf %325, %322 : vector<8x128xf32>
    %cst_156 = arith.constant 4.471500e-02 : f32
    %327 = vector.broadcast %cst_156 : f32 to vector<8x128xf32>
    %328 = arith.mulf %327, %326 : vector<8x128xf32>
    %329 = arith.addf %322, %328 : vector<8x128xf32>
    %cst_157 = arith.constant 0.797884583 : f32
    %330 = vector.broadcast %cst_157 : f32 to vector<8x128xf32>
    %331 = arith.mulf %330, %329 : vector<8x128xf32>
    %332 = math.tanh %331 : vector<8x128xf32>
    %cst_158 = arith.constant 1.000000e+00 : f32
    %333 = vector.broadcast %cst_158 : f32 to vector<8x128xf32>
    %334 = arith.addf %333, %332 : vector<8x128xf32>
    %335 = arith.mulf %324, %334 : vector<8x128xf32>
    %336 = arith.truncf %335 : vector<8x128xf32> to vector<8x128xbf16>
    %337 = arith.mulf %234, %336 : vector<8x128xbf16>
    %338 = arith.addf %337, %181 : vector<8x128xbf16>
    %c17_159 = arith.constant 17 : index
    %c0_160 = arith.constant 0 : index
    %c0_161 = arith.constant 0 : index
    %339 = vector.load %arg4[%c17_159, %c0_160, %c0_161] : memref<26x128x128xbf16, #tpu.memory_space<vmem>>, vector<1x128x128xbf16>
    %340 = vector.shape_cast %339 : vector<1x128x128xbf16> to vector<128x128xbf16>
    %cst_162 = arith.constant dense<0.000000e+00> : vector<8x128xf32>
    %341 = tpu.matmul %338, %340, %cst_162 {dimension_numbers = #tpu.dot_dimension_numbers<[1], [0], [0], [1], [0, 0, 1, 1], [], []>} : vector<8x128xbf16>, vector<128x128xbf16>, vector<8x128xf32> -> vector<8x128xf32>
    %c18_163 = arith.constant 18 : index
    %c0_164 = arith.constant 0 : index
    %c0_165 = arith.constant 0 : index
    %342 = vector.load %arg4[%c18_163, %c0_164, %c0_165] : memref<26x128x128xbf16, #tpu.memory_space<vmem>>, vector<1x128x128xbf16>
    %343 = vector.shape_cast %342 : vector<1x128x128xbf16> to vector<128x128xbf16>
    %cst_166 = arith.constant dense<0.000000e+00> : vector<8x128xf32>
    %344 = tpu.matmul %88, %343, %cst_166 {dimension_numbers = #tpu.dot_dimension_numbers<[1], [0], [0], [1], [0, 0, 1, 1], [], []>} : vector<8x128xbf16>, vector<128x128xbf16>, vector<8x128xf32> -> vector<8x128xf32>
    %345 = arith.addf %341, %344 : vector<8x128xf32>
    %c20 = arith.constant 20 : index
    %c0_167 = arith.constant 0 : index
    %346 = vector.load %arg6[%c20, %c0_167] : memref<27x128xf32, #tpu.memory_space<vmem>>, vector<1x128xf32>
    %347 = vector.broadcast %346 : vector<1x128xf32> to vector<8x128xf32>
    %348 = arith.addf %345, %347 : vector<8x128xf32>
    %349 = arith.truncf %348 : vector<8x128xf32> to vector<8x128xbf16>
    %c19_168 = arith.constant 19 : index
    %c0_169 = arith.constant 0 : index
    %c0_170 = arith.constant 0 : index
    %350 = vector.load %arg4[%c19_168, %c0_169, %c0_170] : memref<26x128x128xbf16, #tpu.memory_space<vmem>>, vector<1x128x128xbf16>
    %351 = vector.shape_cast %350 : vector<1x128x128xbf16> to vector<128x128xbf16>
    %cst_171 = arith.constant dense<0.000000e+00> : vector<8x128xf32>
    %352 = tpu.matmul %349, %351, %cst_171 {dimension_numbers = #tpu.dot_dimension_numbers<[1], [0], [0], [1], [0, 0, 1, 1], [], []>} : vector<8x128xbf16>, vector<128x128xbf16>, vector<8x128xf32> -> vector<8x128xf32>
    %c21 = arith.constant 21 : index
    %c0_172 = arith.constant 0 : index
    %353 = vector.load %arg6[%c21, %c0_172] : memref<27x128xf32, #tpu.memory_space<vmem>>, vector<1x128xf32>
    %354 = vector.broadcast %353 : vector<1x128xf32> to vector<8x128xf32>
    %355 = arith.addf %352, %354 : vector<8x128xf32>
    %cst_173 = arith.constant 5.000000e-01 : f32
    %356 = vector.broadcast %cst_173 : f32 to vector<8x128xf32>
    %357 = arith.mulf %356, %355 : vector<8x128xf32>
    %358 = arith.mulf %355, %355 : vector<8x128xf32>
    %359 = arith.mulf %358, %355 : vector<8x128xf32>
    %cst_174 = arith.constant 4.471500e-02 : f32
    %360 = vector.broadcast %cst_174 : f32 to vector<8x128xf32>
    %361 = arith.mulf %360, %359 : vector<8x128xf32>
    %362 = arith.addf %355, %361 : vector<8x128xf32>
    %cst_175 = arith.constant 0.797884583 : f32
    %363 = vector.broadcast %cst_175 : f32 to vector<8x128xf32>
    %364 = arith.mulf %363, %362 : vector<8x128xf32>
    %365 = math.tanh %364 : vector<8x128xf32>
    %cst_176 = arith.constant 1.000000e+00 : f32
    %366 = vector.broadcast %cst_176 : f32 to vector<8x128xf32>
    %367 = arith.addf %366, %365 : vector<8x128xf32>
    %368 = arith.mulf %357, %367 : vector<8x128xf32>
    %369 = arith.truncf %368 : vector<8x128xf32> to vector<8x128xbf16>
    %c20_177 = arith.constant 20 : index
    %c0_178 = arith.constant 0 : index
    %c0_179 = arith.constant 0 : index
    %370 = vector.load %arg4[%c20_177, %c0_178, %c0_179] : memref<26x128x128xbf16, #tpu.memory_space<vmem>>, vector<1x128x128xbf16>
    %371 = vector.shape_cast %370 : vector<1x128x128xbf16> to vector<128x128xbf16>
    %cst_180 = arith.constant dense<0.000000e+00> : vector<8x128xf32>
    %372 = tpu.matmul %369, %371, %cst_180 {dimension_numbers = #tpu.dot_dimension_numbers<[1], [0], [0], [1], [0, 0, 1, 1], [], []>} : vector<8x128xbf16>, vector<128x128xbf16>, vector<8x128xf32> -> vector<8x128xf32>
    %c22 = arith.constant 22 : index
    %c0_181 = arith.constant 0 : index
    %373 = vector.load %arg6[%c22, %c0_181] : memref<27x128xf32, #tpu.memory_space<vmem>>, vector<1x128xf32>
    %374 = vector.broadcast %373 : vector<1x128xf32> to vector<8x128xf32>
    %375 = arith.addf %372, %374 : vector<8x128xf32>
    %cst_182 = arith.constant 5.000000e-01 : f32
    %376 = vector.broadcast %cst_182 : f32 to vector<8x128xf32>
    %377 = arith.mulf %376, %375 : vector<8x128xf32>
    %378 = arith.mulf %375, %375 : vector<8x128xf32>
    %379 = arith.mulf %378, %375 : vector<8x128xf32>
    %cst_183 = arith.constant 4.471500e-02 : f32
    %380 = vector.broadcast %cst_183 : f32 to vector<8x128xf32>
    %381 = arith.mulf %380, %379 : vector<8x128xf32>
    %382 = arith.addf %375, %381 : vector<8x128xf32>
    %cst_184 = arith.constant 0.797884583 : f32
    %383 = vector.broadcast %cst_184 : f32 to vector<8x128xf32>
    %384 = arith.mulf %383, %382 : vector<8x128xf32>
    %385 = math.tanh %384 : vector<8x128xf32>
    %cst_185 = arith.constant 1.000000e+00 : f32
    %386 = vector.broadcast %cst_185 : f32 to vector<8x128xf32>
    %387 = arith.addf %386, %385 : vector<8x128xf32>
    %388 = arith.mulf %377, %387 : vector<8x128xf32>
    %389 = arith.truncf %388 : vector<8x128xf32> to vector<8x128xbf16>
    %c21_186 = arith.constant 21 : index
    %c0_187 = arith.constant 0 : index
    %c0_188 = arith.constant 0 : index
    %390 = vector.load %arg4[%c21_186, %c0_187, %c0_188] : memref<26x128x128xbf16, #tpu.memory_space<vmem>>, vector<1x128x128xbf16>
    %391 = vector.shape_cast %390 : vector<1x128x128xbf16> to vector<128x128xbf16>
    %cst_189 = arith.constant dense<0.000000e+00> : vector<8x128xf32>
    %392 = tpu.matmul %389, %391, %cst_189 {dimension_numbers = #tpu.dot_dimension_numbers<[1], [0], [0], [1], [0, 0, 1, 1], [], []>} : vector<8x128xbf16>, vector<128x128xbf16>, vector<8x128xf32> -> vector<8x128xf32>
    %c23 = arith.constant 23 : index
    %c0_190 = arith.constant 0 : index
    %393 = vector.load %arg6[%c23, %c0_190] : memref<27x128xf32, #tpu.memory_space<vmem>>, vector<1x128xf32>
    %394 = vector.broadcast %393 : vector<1x128xf32> to vector<8x128xf32>
    %395 = arith.addf %392, %394 : vector<8x128xf32>
    %cst_191 = arith.constant 5.000000e-01 : f32
    %396 = vector.broadcast %cst_191 : f32 to vector<8x128xf32>
    %397 = arith.mulf %396, %395 : vector<8x128xf32>
    %398 = arith.mulf %395, %395 : vector<8x128xf32>
    %399 = arith.mulf %398, %395 : vector<8x128xf32>
    %cst_192 = arith.constant 4.471500e-02 : f32
    %400 = vector.broadcast %cst_192 : f32 to vector<8x128xf32>
    %401 = arith.mulf %400, %399 : vector<8x128xf32>
    %402 = arith.addf %395, %401 : vector<8x128xf32>
    %cst_193 = arith.constant 0.797884583 : f32
    %403 = vector.broadcast %cst_193 : f32 to vector<8x128xf32>
    %404 = arith.mulf %403, %402 : vector<8x128xf32>
    %405 = math.tanh %404 : vector<8x128xf32>
    %cst_194 = arith.constant 1.000000e+00 : f32
    %406 = vector.broadcast %cst_194 : f32 to vector<8x128xf32>
    %407 = arith.addf %406, %405 : vector<8x128xf32>
    %408 = arith.mulf %397, %407 : vector<8x128xf32>
    %409 = arith.truncf %408 : vector<8x128xf32> to vector<8x128xbf16>
    %c22_195 = arith.constant 22 : index
    %c0_196 = arith.constant 0 : index
    %c0_197 = arith.constant 0 : index
    %410 = vector.load %arg4[%c22_195, %c0_196, %c0_197] : memref<26x128x128xbf16, #tpu.memory_space<vmem>>, vector<1x128x128xbf16>
    %411 = vector.shape_cast %410 : vector<1x128x128xbf16> to vector<128x128xbf16>
    %cst_198 = arith.constant dense<0.000000e+00> : vector<8x128xf32>
    %412 = tpu.matmul %409, %411, %cst_198 {dimension_numbers = #tpu.dot_dimension_numbers<[1], [0], [0], [1], [0, 0, 1, 1], [], []>} : vector<8x128xbf16>, vector<128x128xbf16>, vector<8x128xf32> -> vector<8x128xf32>
    %c24 = arith.constant 24 : index
    %c0_199 = arith.constant 0 : index
    %413 = vector.load %arg6[%c24, %c0_199] : memref<27x128xf32, #tpu.memory_space<vmem>>, vector<1x128xf32>
    %414 = vector.broadcast %413 : vector<1x128xf32> to vector<8x128xf32>
    %415 = arith.addf %412, %414 : vector<8x128xf32>
    %cst_200 = arith.constant 5.000000e-01 : f32
    %416 = vector.broadcast %cst_200 : f32 to vector<8x128xf32>
    %417 = arith.mulf %416, %415 : vector<8x128xf32>
    %418 = arith.mulf %415, %415 : vector<8x128xf32>
    %419 = arith.mulf %418, %415 : vector<8x128xf32>
    %cst_201 = arith.constant 4.471500e-02 : f32
    %420 = vector.broadcast %cst_201 : f32 to vector<8x128xf32>
    %421 = arith.mulf %420, %419 : vector<8x128xf32>
    %422 = arith.addf %415, %421 : vector<8x128xf32>
    %cst_202 = arith.constant 0.797884583 : f32
    %423 = vector.broadcast %cst_202 : f32 to vector<8x128xf32>
    %424 = arith.mulf %423, %422 : vector<8x128xf32>
    %425 = math.tanh %424 : vector<8x128xf32>
    %cst_203 = arith.constant 1.000000e+00 : f32
    %426 = vector.broadcast %cst_203 : f32 to vector<8x128xf32>
    %427 = arith.addf %426, %425 : vector<8x128xf32>
    %428 = arith.mulf %417, %427 : vector<8x128xf32>
    %429 = arith.truncf %428 : vector<8x128xf32> to vector<8x128xbf16>
    %c23_204 = arith.constant 23 : index
    %c0_205 = arith.constant 0 : index
    %c0_206 = arith.constant 0 : index
    %430 = vector.load %arg4[%c23_204, %c0_205, %c0_206] : memref<26x128x128xbf16, #tpu.memory_space<vmem>>, vector<1x128x128xbf16>
    %431 = vector.shape_cast %430 : vector<1x128x128xbf16> to vector<128x128xbf16>
    %cst_207 = arith.constant dense<0.000000e+00> : vector<8x128xf32>
    %432 = tpu.matmul %429, %431, %cst_207 {dimension_numbers = #tpu.dot_dimension_numbers<[1], [0], [0], [1], [0, 0, 1, 1], [], []>} : vector<8x128xbf16>, vector<128x128xbf16>, vector<8x128xf32> -> vector<8x128xf32>
    %c24_208 = arith.constant 24 : index
    %c0_209 = arith.constant 0 : index
    %c0_210 = arith.constant 0 : index
    %433 = vector.load %arg4[%c24_208, %c0_209, %c0_210] : memref<26x128x128xbf16, #tpu.memory_space<vmem>>, vector<1x128x128xbf16>
    %434 = vector.shape_cast %433 : vector<1x128x128xbf16> to vector<128x128xbf16>
    %cst_211 = arith.constant dense<0.000000e+00> : vector<8x128xf32>
    %435 = tpu.matmul %48, %434, %cst_211 {dimension_numbers = #tpu.dot_dimension_numbers<[1], [0], [0], [1], [0, 0, 1, 1], [], []>} : vector<8x128xbf16>, vector<128x128xbf16>, vector<8x128xf32> -> vector<8x128xf32>
    %436 = arith.addf %432, %435 : vector<8x128xf32>
    %c25 = arith.constant 25 : index
    %c0_212 = arith.constant 0 : index
    %437 = vector.load %arg6[%c25, %c0_212] : memref<27x128xf32, #tpu.memory_space<vmem>>, vector<1x128xf32>
    %438 = vector.broadcast %437 : vector<1x128xf32> to vector<8x128xf32>
    %439 = arith.addf %436, %438 : vector<8x128xf32>
    %cst_213 = arith.constant 0.000000e+00 : f32
    %440 = vector.broadcast %cst_213 : f32 to vector<8x128xf32>
    %441 = arith.maximumf %439, %440 : vector<8x128xf32>
    %442 = arith.truncf %441 : vector<8x128xf32> to vector<8x128xbf16>
    %c25_214 = arith.constant 25 : index
    %c0_215 = arith.constant 0 : index
    %c0_216 = arith.constant 0 : index
    %443 = vector.load %arg4[%c25_214, %c0_215, %c0_216] : memref<26x128x128xbf16, #tpu.memory_space<vmem>>, vector<1x128x128xbf16>
    %444 = vector.shape_cast %443 : vector<1x128x128xbf16> to vector<128x128xbf16>
    %cst_217 = arith.constant dense<0.000000e+00> : vector<8x128xf32>
    %445 = tpu.matmul %442, %444, %cst_217 {dimension_numbers = #tpu.dot_dimension_numbers<[1], [0], [0], [1], [0, 0, 1, 1], [], []>} : vector<8x128xbf16>, vector<128x128xbf16>, vector<8x128xf32> -> vector<8x128xf32>
    %c26 = arith.constant 26 : index
    %c0_218 = arith.constant 0 : index
    %446 = vector.load %arg6[%c26, %c0_218] : memref<27x128xf32, #tpu.memory_space<vmem>>, vector<1x128xf32>
    %447 = vector.broadcast %446 : vector<1x128xf32> to vector<8x128xf32>
    %448 = arith.addf %445, %447 : vector<8x128xf32>
    %c0_219 = arith.constant 0 : index
    %c0_220 = arith.constant 0 : index
    %449 = vector.load %arg7[%c0_219, %c0_220] : memref<8x128xf32, #tpu.memory_space<vmem>>, vector<8x128xf32>
    tpu.vector_store %arg7[%c0_219, %c0_220], %448 {strides = array<i32>} : memref<8x128xf32, #tpu.memory_space<vmem>>, vector<8x128xf32>,
    return
  }
  func.func @transform_0(%arg0: i32) -> (i32, i32) {
    %c0_i32 = arith.constant 0 : i32
    %c0_i32_0 = arith.constant 0 : i32
    return %arg0, %c0_i32 : i32, i32
  }
  func.func @transform_1(%arg0: i32) -> (i32, i32) {
    %c0_i32 = arith.constant 0 : i32
    %c0_i32_0 = arith.constant 0 : i32
    return %arg0, %c0_i32 : i32, i32
  }
  func.func @transform_2(%arg0: i32) -> (i32, i32) {
    %c0_i32 = arith.constant 0 : i32
    %c0_i32_0 = arith.constant 0 : i32
    return %arg0, %c0_i32 : i32, i32
  }
  func.func @transform_3(%arg0: i32) -> (i32, i32, i32) {
    %c0_i32 = arith.constant 0 : i32
    %c0_i32_0 = arith.constant 0 : i32
    %c0_i32_1 = arith.constant 0 : i32
    %c0_i32_2 = arith.constant 0 : i32
    return %c0_i32, %c0_i32_0, %c0_i32_1 : i32, i32, i32
  }
  func.func @transform_4(%arg0: i32) -> (i32, i32, i32) {
    %c0_i32 = arith.constant 0 : i32
    %c0_i32_0 = arith.constant 0 : i32
    %c0_i32_1 = arith.constant 0 : i32
    %c0_i32_2 = arith.constant 0 : i32
    return %c0_i32, %c0_i32_0, %c0_i32_1 : i32, i32, i32
  }
  func.func @transform_5(%arg0: i32) -> (i32, i32) {
    %c0_i32 = arith.constant 0 : i32
    %c0_i32_0 = arith.constant 0 : i32
    %c0_i32_1 = arith.constant 0 : i32
    return %c0_i32, %c0_i32_0 : i32, i32
  }
  func.func @transform_6(%arg0: i32) -> (i32, i32) {
    %c0_i32 = arith.constant 0 : i32
    %c0_i32_0 = arith.constant 0 : i32
    return %arg0, %c0_i32 : i32, i32
  }
}

</mosaic_0001>

<bundles_post_ra>
// kernel: context_unet.1
= control target key start
LH: loop header
LB: loop body
LE: loop exit
PB: predicated region body
PF: predicated region fallthrough
CT: control target
= control target key end

     0   :  { %11 = vsyncpa [#allocation3], 0  ;;  %s4123_s0 = inlined_call_operand.vmem [shape: f32[8,128], index: 0, kind: input, shape index: {}]   ;;  %s4124_s1 = inlined_call_operand.vmem [shape: f32[8,128], index: 1, kind: input, shape index: {}]   ;;  %s4125_s2 = inlined_call_operand.vmem [shape: f32[8,128], index: 2, kind: input, shape index: {}]   ;;  %s4126_s3 = inlined_call_operand.hbm [shape: bf16[26,128,128], index: 3, kind: input, shape index: {}]   ;;  %s4127_s4 = inlined_call_operand.hbm [shape: bf16[2,128,256], index: 4, kind: input, shape index: {}]   ;;  %s4128_s5 = inlined_call_operand.vmem [shape: f32[27,128], index: 5, kind: input, shape index: {}]   ;;  %s4129_s6 = inlined_call_operand.vmem [shape: f32[8,128], index: 6, kind: output, shape index: {}]  }
   0x1   :  { %s23_s23 = sshll.u32 %s4126_s3, 4  ;;  %s24_s23 = int_to_ptr.hbm [resolvable:$true] %s23_s23 }
   0x2   :  { %12 = vsyncpa [#allocation5], 0  ;;  %s3947_s24 = smov [#allocation2]   ;;  %s36_s28 = sshll.u32 %s4127_s4, 4  ;;  %s37_s28 = int_to_ptr.hbm [resolvable:$true] %s36_s28 }
   0x3   :  { %s25_s25 = sshll.u32 %s3947_s24, 4  ;;  %s3948_s29 = smov 64   ;;  %s26_s25 = int_to_ptr.vmem [resolvable:$true] %s25_s25 }
   0x4   :  { %s3949_s30 = smov 4   ;;  %s3950_s7 = smov [#allocation4]  }
   0x5   :  { %31 = dma.hbm_to_vmem [thread:$0]  %s24_s23, 26624, %s26_s25, [#allocation3], %s3948_s29, %s3948_s29, %s3949_s30  }
   0x6   :  { %s38_s8 = sshll.u32 %s3950_s7, 4  ;;  %s3951_s9 = smov 128   ;;  %s39_s8 = int_to_ptr.vmem [resolvable:$true] %s38_s8 }
   0x7   :  { %s3952_s10 = smov 8  }
   0x8   :  { %44 = dma.hbm_to_vmem [thread:$0]  %s37_s28, 4096, %s39_s8, [#allocation5], %s3951_s9, %s3951_s9, %s3952_s10  }
   0x9   :  { %3943 = dma.done.wait [#allocation3], 26624  }
   0xa   :  { %3944 = vsyncadd [#allocation3], 4294940672 }
   0xb   :  { %3945 = dma.done.wait [#allocation5], 4096  }
   0xc   :  { %3946 = vsyncadd [#allocation5], 4294963200  ;;  %v3588_v0 = vld [vmem:[#allocation2 + $0x38] sm:$0xff]  ;;  %v3587_v1 = vld [vmem:[#allocation2 + $0x30] sm:$0xff]  ;;  %v3953_v54 = vmov 1068842933  }
   0xd   :  { %128 = vmatpush.bf16.msra.mxu0 %v3588_v0  ;;  %v3596_v2 = vld [vmem:[#allocation2 + $0x78] sm:$0xff]  ;;  %v3586_v3 = vld [vmem:[#allocation2 + $0x28] sm:$0xff]  ;;  %v3595_v4 = vld [vmem:[#allocation2 + $0x70] sm:$0xff]  ;;  %v247_v55 = vunpack.c.h.bf16 %v3953_v54  ;;  %v248_v56 = vunpack.c.l.bf16 %v3953_v54 }
   0xe   :  { %218 = vmatpush.bf16.msra.mxu1 %v3596_v2  ;;  %v3585_v5 = vld [vmem:[#allocation2 + $0x20] sm:$0xff]  ;;  %v3584_v6 = vld [vmem:[#allocation2 + $0x18] sm:$0xff]  ;;  %v3583_v7 = vld [vmem:[#allocation2 + $0x10] sm:$0xff] }
   0xf   :  { %v3582_v8 = vld [vmem:[#allocation2 + $0x8] sm:$0xff]  ;;  %v3581_v9 = vld [vmem:[#allocation2] sm:$0xff]  ;;  %v3592_v14 = vld [vmem:[#allocation2 + $0x58] sm:$0xff] }
  0x10   :  { %v56_v10 = vld [vmem:[%s4123_s0] sm:$0xff]  ;;  %v3594_v12 = vld [vmem:[#allocation2 + $0x68] sm:$0xff]  ;;  %v3591_v15 = vld [vmem:[#allocation2 + $0x50] sm:$0xff] }
  0x11   :  { %129 = vmatpush.bf16.msra.mxu0 %v3587_v1  ;;  %v3998_v11 = vpack.c.bf16 %v56_v10, %v56_v10  ;;  %v3593_v13 = vld [vmem:[#allocation2 + $0x60] sm:$0xff]  ;;  %v3590_v16 = vld [vmem:[#allocation2 + $0x48] sm:$0xff]  ;;  %v3604_v32 = vld [vmem:[#allocation2 + $0xb8] sm:$0xff] }
  0x12   :  { %219 = vmatpush.bf16.msra.mxu1 %v3595_v4  ;;  %v3589_v17 = vld [vmem:[#allocation2 + $0x40] sm:$0xff]  ;;  %321 = vmatpush.bf16.msra.mxu2 %v3604_v32  ;;  %v3603_v33 = vld [vmem:[#allocation2 + $0xb0] sm:$0xff]  ;;  %v3602_v34 = vld [vmem:[#allocation2 + $0xa8] sm:$0xff] }
  0x13   :  { %v3828_v18 = vld [vmem:[%s4128_s5] ss:$0 sm:$0xff]  ;;  %v3600_v36 = vld [vmem:[#allocation2 + $0x98] sm:$0xff]  ;;  %v3599_v37 = vld [vmem:[#allocation2 + $0x90] sm:$0xff]  ;;  %v241_v58 = vunpack.c.l.bf16 %v3998_v11 }
  0x14   :  { %v3601_v35 = vld [vmem:[#allocation2 + $0xa0] sm:$0xff]  ;;  %v3598_v38 = vld [vmem:[#allocation2 + $0x88] sm:$0xff]  ;;  %v3612_v45 = vld [vmem:[#allocation2 + $0xf8] sm:$0xff] }
  0x15   :  { %130 = vmatpush.bf16.msra.mxu0 %v3586_v3  ;;  %v3829_v39 = vld [vmem:[%s4128_s5 + $0x1] ss:$0 sm:$0xff]  ;;  %411 = vmatpush.bf16.msra.mxu3 %v3612_v45  ;;  %v3611_v48 = vld [vmem:[#allocation2 + $0xf0] sm:$0xff]  ;;  %v3606_v10 = vld [vmem:[#allocation2 + $0xc8] sm:$0xff] }
  0x16   :  { %220 = vmatpush.bf16.msra.mxu1 %v3594_v12  ;;  %322 = vmatpush.bf16.msra.mxu2 %v3603_v33  ;;  %v3597_v40 = vld [vmem:[#allocation2 + $0x80] sm:$0xff]  ;;  %v3620_v12 = vld [vmem:[#allocation2 + $0x138] sm:$0xff]  ;;  %v3614_v32 = vld [vmem:[#allocation2 + $0x108] sm:$0xff] }
  0x17   :  { %v3613_v33 = vld [vmem:[#allocation2 + $0x100] sm:$0xff] }
  0x19   :  { %131 = vmatpush.bf16.msra.mxu0 %v3585_v5  ;;  %412 = vmatpush.bf16.msra.mxu3 %v3611_v48 }
  0x1a   :  { %221 = vmatpush.bf16.msra.mxu1 %v3593_v13  ;;  %323 = vmatpush.bf16.msra.mxu2 %v3602_v34  ;;  %v3619_v13 = vld [vmem:[#allocation2 + $0x130] sm:$0xff] }
  0x1b   :  { %v2871_v34 = vld [vmem:[#allocation4 + $0x70] sm:$0xf] }
  0x1d   :  { %132 = vmatpush.bf16.msra.mxu0 %v3584_v6  ;;  %v3610_v6 = vld [vmem:[#allocation2 + $0xe8] sm:$0xff] }
  0x1e   :  { %222 = vmatpush.bf16.msra.mxu1 %v3592_v14  ;;  %324 = vmatpush.bf16.msra.mxu2 %v3601_v35  ;;  %v3830_v14 = vld [vmem:[%s4128_s5 + $0x2] ss:$0 sm:$0xff]  ;;  %v3644_v35 = vld [vmem:[#allocation4 + $0x74] sm:$0xf0] }
  0x1f   :  { %413 = vmatpush.bf16.msra.mxu3 %v3610_v6  ;;  %v2999_v6 = vld [vmem:[#allocation4 + $0xf0] sm:$0xf] }
  0x21   :  { %133 = vmatpush.bf16.msra.mxu0 %v3583_v7  ;;  %v3609_v7 = vld [vmem:[#allocation2 + $0xe0] sm:$0xff] }
  0x22   :  { %223 = vmatpush.bf16.msra.mxu1 %v3591_v15  ;;  %325 = vmatpush.bf16.msra.mxu2 %v3600_v36  ;;  %v2863_v36 = vld [vmem:[#allocation4 + $0x60] sm:$0xf] }
  0x23   :  { %414 = vmatpush.bf16.msra.mxu3 %v3609_v7  ;;  %v3676_v7 = vld [vmem:[#allocation4 + $0xf4] sm:$0xf0] }
  0x25   :  { %134 = vmatpush.bf16.msra.mxu0 %v3582_v8  ;;  %v3608_v8 = vld [vmem:[#allocation2 + $0xd8] sm:$0xff] }
  0x26   :  { %224 = vmatpush.bf16.msra.mxu1 %v3590_v16  ;;  %326 = vmatpush.bf16.msra.mxu2 %v3599_v37  ;;  %v2872_v37 = vor.u32 %v3644_v35, %v2871_v34  ;;  %v2943_v34 = vld [vmem:[#allocation4 + $0x80] sm:$0xf]  ;;  %v3662_v35 = vld [vmem:[#allocation4 + $0x84] sm:$0xf0] }
  0x27   :  { %415 = vmatpush.bf16.msra.mxu3 %v3608_v8 }
  0x29   :  { %135 = vmatpush.bf16.msra.mxu0 %v3581_v9  ;;  %v3607_v9 = vld [vmem:[#allocation2 + $0xd0] sm:$0xff] }
  0x2a   :  { %225 = vmatpush.bf16.msra.mxu1 %v3589_v17  ;;  %327 = vmatpush.bf16.msra.mxu2 %v3598_v38  ;;  %v3642_v38 = vld [vmem:[#allocation4 + $0x64] sm:$0xf0] }
  0x2b   :  { %416 = vmatpush.bf16.msra.mxu3 %v3607_v9 }
  0x2c   :  { %136 = vmatmul.bf16.vlgmr.msra.gmra.mxu0 %v3998_v11  ;;  %v3605_v11 = vld [vmem:[#allocation2 + $0xc0] sm:$0xff] }
  0x2d   :  { %501 = vmatpush.bf16.msrb.mxu0 %v3620_v12 }
  0x2e   :  { %328 = vmatpush.bf16.msra.mxu2 %v3597_v40  ;;  %v2864_v40 = vor.u32 %v3642_v38, %v2863_v36  ;;  %v2944_v36 = vor.u32 %v3662_v35, %v2943_v34  ;;  %v3626_v38 = vld [vmem:[#allocation2 + $0x168] sm:$0xff]  ;;  %v3645_v35 = vld [vmem:[#allocation2 + $0x180] sm:$0xff] }
  0x2f   :  { %417 = vmatpush.bf16.msra.mxu3 %v3606_v10  ;;  %v2993_v34 = vld [vmem:[#allocation4 + $0xe8] sm:$0xf0] }
  0x31   :  { %502 = vmatpush.bf16.msrb.mxu0 %v3619_v13  ;;  %v3000_v13 = vor.u32 %v3676_v7, %v2999_v6 }
  0x32   :  { %710 = vmatpush.bf16.msrb.mxu2 %v2872_v37  ;;  %v58_v37 = vld [vmem:[%s4124_s1] sm:$0xff] }
  0x33   :  { %418 = vmatpush.bf16.msra.mxu3 %v3605_v11  ;;  %v60_v11 = vld [vmem:[%s4125_s2] sm:$0xff] }
  0x36   :  { %711 = vmatpush.bf16.msrb.mxu2 %v2864_v40  ;;  %v3625_v40 = vld [vmem:[#allocation2 + $0x160] sm:$0xff] }
  0xa9   :  { %v137_v19 = vpop.f32.mrf.mxu0 }
  0xaa   :  { %v138_v20 = vadd.f32 %v3828_v18, %v137_v19 }
  0xac   :  { %v142_v21 = vmul.f32 %v138_v20, %v138_v20  ;;  %v141_v28 = vmul.f32 0.5, %v138_v20 }
  0xae   :  { %v143_v22 = vmul.f32 %v142_v21, %v138_v20 }
  0xb0   :  { %v144_v23 = vmul.f32 0.044715, %v143_v22 }
  0xb1   :  { %v139_v24 = vpop.f32.mrf.mxu0 }
  0xb2   :  { %v145_v25 = vadd.f32 %v144_v23, %v138_v20 }
  0xb4   :  { %v146_v26 = vmul.f32 0.7978846, %v145_v25 }
  0xb6   :  { %3855 = vtanh.f32 %v146_v26 }
  0xbc   :  { %v3856_v27 = vpop.eup %3855 }
  0xbd   :  { %v148_v29 = vadd.f32 1.0, %v3856_v27 }
  0xbf   :  { %v149_v30 = vmul.f32 %v148_v29, %v141_v28  ;;  %v3618_v28 = vld [vmem:[#allocation2 + $0x128] sm:$0xff]  ;;  %v3617_v29 = vld [vmem:[#allocation2 + $0x120] sm:$0xff] }
  0xc0   :  { %503 = vmatpush.bf16.msrb.mxu0 %v3618_v28  ;;  %v2959_v28 = vld [vmem:[#allocation4 + $0xa0] sm:$0xf] }
  0xc1   :  { %v150_v31 = vpack.c.bf16 %v149_v30, %v149_v30  ;;  %v3616_v30 = vld [vmem:[#allocation2 + $0x118] sm:$0xff] }
  0xc3   :  { %226 = vmatmul.bf16.vlgmr.msra.gmra.mxu1 %v150_v31  ;;  %v3615_v31 = vld [vmem:[#allocation2 + $0x110] sm:$0xff] }
  0xc4   :  { %504 = vmatpush.bf16.msrb.mxu0 %v3617_v29  ;;  %v3666_v29 = vld [vmem:[#allocation4 + $0xa4] sm:$0xf0] }
  0xc8   :  { %505 = vmatpush.bf16.msrb.mxu0 %v3616_v30  ;;  %v2960_v30 = vor.u32 %v3666_v29, %v2959_v28 }
  0xcc   :  { %506 = vmatpush.bf16.msrb.mxu0 %v3615_v31  ;;  %v2951_v31 = vld [vmem:[#allocation4 + $0x90] sm:$0xf] }
  0xd0   :  { %507 = vmatpush.bf16.msrb.mxu0 %v3614_v32  ;;  %v3664_v32 = vld [vmem:[#allocation4 + $0x94] sm:$0xf0] }
  0xd4   :  { %508 = vmatpush.bf16.msrb.mxu0 %v3613_v33  ;;  %v2952_v33 = vor.u32 %v3664_v32, %v2951_v31 }
 0x140   :  { %v227_v41 = vpop.f32.mrf.mxu1 }
 0x141   :  { %v228_v42 = vadd.f32 %v3829_v39, %v227_v41  ;;  %v3831_v39 = vld [vmem:[%s4128_s5 + $0x3] ss:$0 sm:$0xff]  ;;  %v2855_v41 = vld [vmem:[#allocation4 + $0x50] sm:$0xf] }
 0x143   :  { %v232_v43 = vmul.f32 %v228_v42, %v228_v42  ;;  %v231_v52 = vmul.f32 0.5, %v228_v42 }
 0x145   :  { %v233_v44 = vmul.f32 %v232_v43, %v228_v42 }
 0x147   :  { %v234_v46 = vmul.f32 0.044715, %v233_v44 }
 0x148   :  { %v229_v47 = vpop.f32.mrf.mxu1 }
 0x149   :  { %v235_v49 = vadd.f32 %v234_v46, %v228_v42  ;;  %v3640_v42 = vld [vmem:[#allocation4 + $0x54] sm:$0xf0]  ;;  %v2847_v46 = vld [vmem:[#allocation4 + $0x40] sm:$0xf]  ;;  %v3638_v47 = vld [vmem:[#allocation4 + $0x44] sm:$0xf0] }
 0x14a   :  { %v2856_v45 = vor.u32 %v3640_v42, %v2855_v41  ;;  %v3624_v41 = vld [vmem:[#allocation2 + $0x158] sm:$0xff]  ;;  %v3623_v42 = vld [vmem:[#allocation2 + $0x150] sm:$0xff] }
 0x14b   :  { %v236_v50 = vmul.f32 0.7978846, %v235_v49 }
 0x14c   :  { %712 = vmatpush.bf16.msrb.mxu2 %v2856_v45  ;;  %v3643_v45 = vld [vmem:[#allocation4 + $0x74] sm:$0xf] }
 0x14d   :  { %3857 = vtanh.f32 %v236_v50  ;;  %v2848_v50 = vor.u32 %v3638_v47, %v2847_v46  ;;  %v2873_v46 = vld [vmem:[#allocation4 + $0x78] sm:$0xf0]  ;;  %v3641_v47 = vld [vmem:[#allocation4 + $0x64] sm:$0xf] }
 0x14e   :  { %3859 = vrcp.f32 %v247_v55 }
 0x14f   :  { %3861 = vrcp.f32 %v248_v56 }
 0x150   :  { %713 = vmatpush.bf16.msrb.mxu2 %v2848_v50  ;;  %v3652_v50 = vld [vmem:[#allocation2 + $0x1b8] sm:$0xff] }
 0x151   :  { %819 = vmatpush.bf16.msra.mxu0 %v3652_v50  ;;  %v3833_v50 = vld [vmem:[%s4128_s5 + $0x6] ss:$0 sm:$0xff] }
 0x153   :  { %v3858_v51 = vpop.eup %3857 }
 0x154   :  { %v238_v53 = vadd.f32 1.0, %v3858_v51  ;;  %v3860_v62 = vpop.eup %3859  ;;  %v2839_v51 = vld [vmem:[#allocation4 + $0x30] sm:$0xf] }
 0x155   :  { %v3862_v0 = vpop.eup %3861 }
 0x156   :  { %v239_v57 = vmul.f32 %v238_v53, %v231_v52  ;;  %v3636_v52 = vld [vmem:[#allocation4 + $0x34] sm:$0xf0] }
 0x157   :  { %v2840_v56 = vor.u32 %v3636_v52, %v2839_v51  ;;  %v3832_v51 = vld [vmem:[%s4128_s5 + $0x4] ss:$0 sm:$0xff] }
 0x158   :  { %v240_v59 = vpack.c.bf16 %v239_v57, %v239_v57  ;;  %v2831_v57 = vld [vmem:[#allocation4 + $0x20] sm:$0xf] }
 0x159   :  { %714 = vmatpush.bf16.msrb.mxu2 %v2840_v56 }
 0x15a   :  { %v242_v60 = vunpack.c.l.bf16 %v240_v59 }
 0x15c   :  { %v243_v61 = vadd.f32 %v242_v60, %v241_v58  ;;  %v3634_v58 = vld [vmem:[#allocation4 + $0x24] sm:$0xf0] }
 0x15d   :  { %v2832_v60 = vor.u32 %v3634_v58, %v2831_v57 }
 0x15e   :  { %v244_v63 = vpack.c.bf16 %v243_v61, %v243_v61  ;;  %v2823_v61 = vld [vmem:[#allocation4 + $0x10] sm:$0xf] }
 0x15f   :  { %715 = vmatpush.bf16.msrb.mxu2 %v2832_v60  ;;  %v2849_v60 = vld [vmem:[#allocation4 + $0x48] sm:$0xf0] }
 0x160   :  { %v245_v1 = vunpack.c.h.bf16 %v244_v63  ;;  %v246_v2 = vunpack.c.l.bf16 %v244_v63  ;;  %v3628_v63 = vld [vmem:[#allocation2 + $0x178] sm:$0xff] }
 0x161   :  { %591 = vmatpush.bf16.msrb.mxu1 %v3628_v63 }
 0x162   :  { %v250_v3 = vmul.f32 %v3860_v62, %v245_v1  ;;  %v252_v4 = vmul.f32 %v3862_v0, %v246_v2  ;;  %v3632_v62 = vld [vmem:[#allocation4 + $0x14] sm:$0xf0]  ;;  %v2815_v1 = vld [vmem:[#allocation4] sm:$0xf]  ;;  %v3630_v2 = vld [vmem:[#allocation4 + $0x4] sm:$0xf0] }
 0x163   :  { %v2824_v0 = vor.u32 %v3632_v62, %v2823_v61  ;;  %v2816_v10 = vor.u32 %v3630_v2, %v2815_v1  ;;  %v3650_v61 = vld [vmem:[#allocation2 + $0x1a8] sm:$0xff]  ;;  %v3635_v1 = vld [vmem:[#allocation4 + $0x34] sm:$0xf]  ;;  %v2841_v2 = vld [vmem:[#allocation4 + $0x38] sm:$0xf0] }
 0x164   :  { %v4008_v5 = vpack.c.bf16 %v250_v3, %v252_v4  ;;  %v3627_v3 = vld [vmem:[#allocation2 + $0x170] sm:$0xff] }
 0x165   :  { %592 = vmatpush.bf16.msrb.mxu1 %v3627_v3  ;;  %716 = vmatpush.bf16.msrb.mxu2 %v2824_v0  ;;  %v3649_v3 = vld [vmem:[#allocation2 + $0x1a0] sm:$0xff] }
 0x166   :  { %329 = vmatmul.bf16.vlgmr.msra.gmra.mxu2 %v4008_v5 }
 0x169   :  { %717 = vmatpush.bf16.msrb.mxu2 %v2816_v10  ;;  %593 = vmatpush.bf16.msrb.mxu1 %v3626_v38  ;;  %v3633_v10 = vld [vmem:[#allocation4 + $0x24] sm:$0xf] }
 0x16d   :  { %1021 = vmatpush.bf16.msra.mxu2 %v3000_v13  ;;  %594 = vmatpush.bf16.msrb.mxu1 %v3625_v40  ;;  %v3671_v40 = vld [vmem:[#allocation4 + $0xd4] sm:$0xf] }
 0x171   :  { %595 = vmatpush.bf16.msrb.mxu1 %v3624_v41  ;;  %v2985_v41 = vld [vmem:[#allocation4 + $0xd8] sm:$0xf0] }
 0x175   :  { %596 = vmatpush.bf16.msrb.mxu1 %v3623_v42  ;;  %v3683_v42 = vld [vmem:[#allocation2 + $0x230] sm:$0xff] }
 0x1e9   :  { %v330_v15 = vpop.f32.mrf.mxu2 }
 0x1ea   :  { %v331_v16 = vadd.f32 %v3830_v14, %v330_v15  ;;  %v2991_v14 = vld [vmem:[#allocation4 + $0xe0] sm:$0xf]  ;;  %v3674_v15 = vld [vmem:[#allocation4 + $0xe4] sm:$0xf0] }
 0x1ec   :  { %v335_v17 = vmul.f32 %v331_v16, %v331_v16  ;;  %v334_v24 = vmul.f32 0.5, %v331_v16 }
 0x1ee   :  { %v336_v18 = vmul.f32 %v335_v17, %v331_v16  ;;  %v4022_v17 = vpack.c.bf16 %v60_v11, %v60_v11  ;;  %v2833_v11 = vld [vmem:[#allocation4 + $0x28] sm:$0xf0] }
 0x1f0   :  { %v337_v19 = vmul.f32 0.044715, %v336_v18  ;;  %v2992_v18 = vor.u32 %v3674_v15, %v2991_v14  ;;  %718 = vmatmul.bf16.vlgmr.msrb.gmra.mxu2 %v4022_v17  ;;  %v2836_v14 = vor.u32 %v3633_v10, %v2833_v11  ;;  %v3631_v15 = vld [vmem:[#allocation4 + $0x14] sm:$0xf]  ;;  %v3680_v10 = vld [vmem:[#allocation2 + $0x218] sm:$0xff] }
 0x1f1   :  { %v332_v20 = vpop.f32.mrf.mxu2 }
 0x1f2   :  { %v338_v21 = vadd.f32 %v337_v19, %v331_v16  ;;  %v2983_v19 = vld [vmem:[#allocation4 + $0xd0] sm:$0xf]  ;;  %v3672_v20 = vld [vmem:[#allocation4 + $0xd4] sm:$0xf0]  ;;  %1022 = vmatpush.bf16.msra.mxu2 %v2992_v18  ;;  %v2825_v18 = vld [vmem:[#allocation4 + $0x18] sm:$0xf0] }
 0x1f4   :  { %v339_v22 = vmul.f32 0.7978846, %v338_v21  ;;  %v2984_v21 = vor.u32 %v3672_v20, %v2983_v19  ;;  %v3647_v19 = vld [vmem:[#allocation2 + $0x190] sm:$0xff] }
 0x1f6   :  { %3863 = vtanh.f32 %v339_v22  ;;  %v2975_v22 = vld [vmem:[#allocation4 + $0xc0] sm:$0xf]  ;;  %1023 = vmatpush.bf16.msra.mxu2 %v2984_v21  ;;  %v2828_v21 = vor.u32 %v3631_v15, %v2825_v18  ;;  %v3834_v15 = vld [vmem:[%s4128_s5 + $0xa] ss:$0 sm:$0xff] }
 0x1fc   :  { %v3864_v23 = vpop.eup %3863 }
 0x1fd   :  { %v341_v25 = vadd.f32 1.0, %v3864_v23  ;;  %v3670_v23 = vld [vmem:[#allocation4 + $0xc4] sm:$0xf0] }
 0x1ff   :  { %v342_v26 = vmul.f32 %v341_v25, %v334_v24  ;;  %v2976_v24 = vor.u32 %v3670_v23, %v2975_v22  ;;  %v2967_v25 = vld [vmem:[#allocation4 + $0xb0] sm:$0xf]  ;;  %v3629_v22 = vld [vmem:[#allocation4 + $0x4] sm:$0xf]  ;;  %v2817_v23 = vld [vmem:[#allocation4 + $0x8] sm:$0xf0] }
 0x201   :  { %v343_v27 = vpack.c.bf16 %v342_v26, %v342_v26  ;;  %v3668_v26 = vld [vmem:[#allocation4 + $0xb4] sm:$0xf0]  ;;  %1024 = vmatpush.bf16.msra.mxu2 %v2976_v24  ;;  %v3646_v24 = vld [vmem:[#allocation2 + $0x188] sm:$0xff] }
 0x203   :  { %419 = vmatmul.bf16.vlgmr.msra.gmra.mxu3 %v343_v27  ;;  %v2968_v27 = vor.u32 %v3668_v26, %v2967_v25  ;;  %v3675_v26 = vld [vmem:[#allocation4 + $0xf4] sm:$0xf] }
 0x205   :  { %1025 = vmatpush.bf16.msra.mxu2 %v2968_v27  ;;  %v3001_v27 = vld [vmem:[#allocation4 + $0xf8] sm:$0xf0] }
 0x206   :  { %v3004_v32 = vor.u32 %v3675_v26, %v3001_v27  ;;  %v3678_v26 = vld [vmem:[#allocation2 + $0x208] sm:$0xff] }
 0x209   :  { %1026 = vmatpush.bf16.msra.mxu2 %v2960_v30  ;;  %v2820_v30 = vor.u32 %v3629_v22, %v2817_v23 }
 0x20d   :  { %1027 = vmatpush.bf16.msra.mxu2 %v2952_v33  ;;  %v3673_v33 = vld [vmem:[#allocation4 + $0xe4] sm:$0xf] }
 0x20e   :  { %v2996_v38 = vor.u32 %v3673_v33, %v2993_v34  ;;  %v3713_v33 = vld [vmem:[#allocation2 + $0x320] sm:$0xff] }
 0x211   :  { %1028 = vmatpush.bf16.msra.mxu2 %v2944_v36 }
 0x273   :  { %v719_v7 = vpop.f32.mrf.mxu2 }
 0x27b   :  { %v721_v20 = vpop.f32.mrf.mxu2 }
 0x286   :  { %v420_v43 = vpop.f32.mrf.mxu3 }
 0x287   :  { %v421_v44 = vadd.f32 %v3831_v39, %v420_v43  ;;  %v4029_v39 = vpack.c.bf16 %v58_v37, %v58_v37  ;;  %v3622_v43 = vld [vmem:[#allocation2 + $0x148] sm:$0xff]  ;;  %v3684_v37 = vld [vmem:[#allocation2 + $0x238] sm:$0xff] }
 0x288   :  { %597 = vmatpush.bf16.msrb.mxu1 %v3622_v43  ;;  %v2988_v43 = vor.u32 %v3671_v40, %v2985_v41  ;;  %v3711_v40 = vld [vmem:[#allocation2 + $0x310] sm:$0xff]  ;;  %v3694_v41 = vld [vmem:[#allocation2 + $0x288] sm:$0xff] }
 0x289   :  { %v425_v48 = vmul.f32 %v421_v44, %v421_v44  ;;  %v424_v8 = vmul.f32 0.5, %v421_v44  ;;  %1029 = vmatmul.bf16.vlgmr.msra.gmra.mxu2 %v4029_v39 }
 0x28b   :  { %v426_v49 = vmul.f32 %v425_v48, %v421_v44  ;;  %v2876_v48 = vor.u32 %v3643_v45, %v2873_v46  ;;  %v2977_v45 = vld [vmem:[#allocation4 + $0xc8] sm:$0xf0] }
 0x28d   :  { %v427_v53 = vmul.f32 0.044715, %v426_v49  ;;  %v2865_v49 = vld [vmem:[#allocation4 + $0x68] sm:$0xf0]  ;;  %723 = vmatpush.bf16.msrb.mxu3 %v2876_v48  ;;  %v2969_v48 = vld [vmem:[#allocation4 + $0xb8] sm:$0xf0] }
 0x28e   :  { %v422_v54 = vpop.f32.mrf.mxu3  ;;  %v2868_v52 = vor.u32 %v3641_v47, %v2865_v49  ;;  %v3667_v47 = vld [vmem:[#allocation4 + $0xb4] sm:$0xf] }
 0x28f   :  { %v428_v55 = vadd.f32 %v427_v53, %v421_v44  ;;  %v3621_v44 = vld [vmem:[#allocation2 + $0x140] sm:$0xff]  ;;  %v3639_v53 = vld [vmem:[#allocation4 + $0x54] sm:$0xf]  ;;  %v2857_v54 = vld [vmem:[#allocation4 + $0x58] sm:$0xf0]  ;;  %v2972_v49 = vor.u32 %v3667_v47, %v2969_v48 }
 0x290   :  { %598 = vmatpush.bf16.msrb.mxu1 %v3621_v44  ;;  %v2860_v58 = vor.u32 %v3639_v53, %v2857_v54  ;;  %v3669_v44 = vld [vmem:[#allocation4 + $0xc4] sm:$0xf] }
 0x291   :  { %v429_v59 = vmul.f32 0.7978846, %v428_v55  ;;  %v3651_v55 = vld [vmem:[#allocation2 + $0x1b0] sm:$0xff]  ;;  %724 = vmatpush.bf16.msrb.mxu3 %v2868_v52  ;;  %v2980_v46 = vor.u32 %v3669_v44, %v2977_v45  ;;  %v3709_v44 = vld [vmem:[#allocation2 + $0x300] sm:$0xff] }
 0x292   :  { %820 = vmatpush.bf16.msra.mxu0 %v3651_v55  ;;  %v3835_v45 = vld [vmem:[%s4128_s5 + $0x5] ss:$0 sm:$0xff] }
 0x293   :  { %3865 = vtanh.f32 %v429_v59  ;;  %v3637_v59 = vld [vmem:[#allocation4 + $0x44] sm:$0xf] }
 0x294   :  { %v2852_v0 = vor.u32 %v3637_v59, %v2849_v60  ;;  %v2961_v59 = vld [vmem:[#allocation4 + $0xa8] sm:$0xf0] }
 0x295   :  { %725 = vmatpush.bf16.msrb.mxu3 %v2860_v58  ;;  %v3665_v58 = vld [vmem:[#allocation4 + $0xa4] sm:$0xf]  ;;  %v3682_v60 = vld [vmem:[#allocation2 + $0x228] sm:$0xff] }
 0x296   :  { %821 = vmatpush.bf16.msra.mxu0 %v3650_v61 }
 0x299   :  { %v3866_v4 = vpop.eup %3865  ;;  %726 = vmatpush.bf16.msrb.mxu3 %v2852_v0  ;;  %v2953_v0 = vld [vmem:[#allocation4 + $0x98] sm:$0xf0] }
 0x29a   :  { %v431_v9 = vadd.f32 1.0, %v3866_v4  ;;  %822 = vmatpush.bf16.msra.mxu0 %v3649_v3 }
 0x29c   :  { %v432_v12 = vmul.f32 %v431_v9, %v424_v8  ;;  %v2844_v9 = vor.u32 %v3635_v1, %v2841_v2  ;;  %v3681_v1 = vld [vmem:[#allocation2 + $0x220] sm:$0xff] }
 0x29e   :  { %v4020_v16 = vpack.c.bf16 %v432_v12, %v432_v12  ;;  %v3648_v12 = vld [vmem:[#allocation2 + $0x198] sm:$0xff]  ;;  %727 = vmatpush.bf16.msrb.mxu3 %v2844_v9  ;;  %v3699_v9 = vld [vmem:[#allocation2 + $0x2b0] sm:$0xff] }
 0x29f   :  { %823 = vmatpush.bf16.msra.mxu0 %v3648_v12  ;;  %v3716_v12 = vld [vmem:[#allocation2 + $0x338] sm:$0xff] }
 0x2a0   :  { %509 = vmatmul.bf16.vlgmr.msrb.gmra.mxu0 %v4020_v16 }
 0x2a2   :  { %728 = vmatpush.bf16.msrb.mxu3 %v2836_v14  ;;  %v3715_v14 = vld [vmem:[#allocation2 + $0x330] sm:$0xff] }
 0x2a3   :  { %824 = vmatpush.bf16.msra.mxu0 %v3647_v19 }
 0x2a6   :  { %729 = vmatpush.bf16.msrb.mxu3 %v2828_v21 }
 0x2a7   :  { %825 = vmatpush.bf16.msra.mxu0 %v3646_v24 }
 0x2aa   :  { %730 = vmatpush.bf16.msrb.mxu3 %v2820_v30 }
 0x2ab   :  { %826 = vmatpush.bf16.msra.mxu0 %v3645_v35 }
 0x2ad   :  { %731 = vmatmul.bf16.vlgmr.msrb.gmra.mxu3 %v4022_v17 }
 0x2ae   :  { %1034 = vmatpush.bf16.msra.mxu3 %v3004_v32  ;;  %v3697_v32 = vld [vmem:[#allocation2 + $0x2a0] sm:$0xff] }
 0x2af   :  { %1130 = vmatpush.bf16.msrb.mxu0 %v3684_v37  ;;  %v3712_v37 = vld [vmem:[#allocation2 + $0x318] sm:$0xff] }
 0x2b2   :  { %1035 = vmatpush.bf16.msra.mxu3 %v2996_v38  ;;  %v3695_v38 = vld [vmem:[#allocation2 + $0x290] sm:$0xff] }
 0x2b3   :  { %1131 = vmatpush.bf16.msrb.mxu0 %v3683_v42  ;;  %v3710_v42 = vld [vmem:[#allocation2 + $0x308] sm:$0xff] }
 0x2b6   :  { %1036 = vmatpush.bf16.msra.mxu3 %v2988_v43  ;;  %v3693_v43 = vld [vmem:[#allocation2 + $0x280] sm:$0xff] }
 0x2b7   :  { %1132 = vmatpush.bf16.msrb.mxu0 %v3682_v60 }
 0x2ba   :  { %1037 = vmatpush.bf16.msra.mxu3 %v2980_v46 }
 0x2bb   :  { %1133 = vmatpush.bf16.msrb.mxu0 %v3681_v1  ;;  %v3706_v1 = vld [vmem:[#allocation2 + $0x2e8] sm:$0xff] }
 0x2be   :  { %1038 = vmatpush.bf16.msra.mxu3 %v2972_v49 }
 0x2bf   :  { %1134 = vmatpush.bf16.msrb.mxu0 %v3680_v10 }
 0x30c   :  { %v1030_v18 = vpop.f32.mrf.mxu2 }
 0x30d   :  { %v1049_v19 = vadd.f32 %v3834_v15, %v1030_v18  ;;  %v3660_v18 = vld [vmem:[#allocation2 + $0x1f8] sm:$0xff] }
 0x30e   :  { %910 = vmatpush.bf16.msra.mxu1 %v3660_v18  ;;  %v3719_v18 = vld [vmem:[#allocation2 + $0x350] sm:$0xff] }
 0x30f   :  { %v1054_v20 = vmul.f32 %v1049_v19, %v1049_v19  ;;  %v1053_v27 = vmul.f32 0.5, %v1049_v19 }
 0x311   :  { %v1055_v21 = vmul.f32 %v1054_v20, %v1049_v19 }
 0x313   :  { %v1056_v22 = vmul.f32 0.044715, %v1055_v21  ;;  %v3658_v21 = vld [vmem:[#allocation2 + $0x1e8] sm:$0xff] }
 0x314   :  { %v1032_v23 = vpop.f32.mrf.mxu2 }
 0x315   :  { %v1057_v24 = vadd.f32 %v1056_v22, %v1049_v19  ;;  %v3659_v19 = vld [vmem:[#allocation2 + $0x1f0] sm:$0xff]  ;;  %v3838_v23 = vld [vmem:[%s4128_s5 + $0xc] ss:$0 sm:$0xff] }
 0x316   :  { %911 = vmatpush.bf16.msra.mxu1 %v3659_v19  ;;  %v3718_v19 = vld [vmem:[#allocation2 + $0x348] sm:$0xff] }
 0x31a   :  { %912 = vmatpush.bf16.msra.mxu1 %v3658_v21  ;;  %v3764_v21 = vld [vmem:[#allocation2 + $0x4b8] sm:$0xff] }
 0x31d   :  { %v510_v56 = vpop.f32.mrf.mxu0 }
 0x31e   :  { %v511_v57 = vadd.f32 %v3832_v51, %v510_v56  ;;  %v738_v51 = vadd.f32 %v3833_v50, %v719_v7  ;;  %v3661_v7 = vld [vmem:[#allocation4 + $0x84] sm:$0xf] }
 0x320   :  { %v515_v62 = vmul.f32 %v511_v57, %v511_v57  ;;  %v514_v28 = vmul.f32 0.5, %v511_v57  ;;  %v743_v52 = vmul.f32 %v738_v51, %v738_v51 }
 0x322   :  { %v516_v63 = vmul.f32 %v515_v62, %v511_v57  ;;  %v744_v53 = vmul.f32 %v743_v52, %v738_v51  ;;  %v2964_v62 = vor.u32 %v3665_v58, %v2961_v59 }
 0x324   :  { %v517_v4 = vmul.f32 0.044715, %v516_v63  ;;  %v745_v17 = vmul.f32 0.044715, %v744_v53  ;;  %v3663_v63 = vld [vmem:[#allocation4 + $0x94] sm:$0xf]  ;;  %1039 = vmatpush.bf16.msra.mxu3 %v2964_v62 }
 0x325   :  { %v512_v6 = vpop.f32.mrf.mxu0  ;;  %v2956_v3 = vor.u32 %v3663_v63, %v2953_v0  ;;  %v3708_v63 = vld [vmem:[#allocation2 + $0x2f8] sm:$0xff]  ;;  %v3707_v0 = vld [vmem:[#allocation2 + $0x2f0] sm:$0xff] }
 0x326   :  { %v518_v8 = vadd.f32 %v517_v4, %v511_v57  ;;  %v746_v54 = vadd.f32 %v745_v17, %v738_v51  ;;  %v742_v57 = vmul.f32 0.5, %v738_v51  ;;  %v3700_v4 = vld [vmem:[#allocation2 + $0x2b8] sm:$0xff] }
 0x327   :  { %1302 = vmatpush.bf16.msrb.mxu2 %v3700_v4 }
 0x328   :  { %v519_v13 = vmul.f32 0.7978846, %v518_v8  ;;  %v747_v55 = vmul.f32 0.7978846, %v746_v54  ;;  %v2945_v8 = vld [vmem:[#allocation4 + $0x88] sm:$0xf0]  ;;  %1040 = vmatpush.bf16.msra.mxu3 %v2956_v3 }
 0x329   :  { %v2948_v11 = vor.u32 %v3661_v7, %v2945_v8  ;;  %v3704_v7 = vld [vmem:[#allocation2 + $0x2d8] sm:$0xff]  ;;  %v3837_v8 = vld [vmem:[%s4128_s5 + $0x7] ss:$0 sm:$0xff] }
 0x32a   :  { %3867 = vtanh.f32 %v519_v13  ;;  %v3679_v13 = vld [vmem:[#allocation2 + $0x210] sm:$0xff] }
 0x32b   :  { %3869 = vtanh.f32 %v747_v55  ;;  %1303 = vmatpush.bf16.msrb.mxu2 %v3699_v9  ;;  %1135 = vmatpush.bf16.msrb.mxu0 %v3679_v13  ;;  %v3703_v9 = vld [vmem:[#allocation2 + $0x2d0] sm:$0xff]  ;;  %v3701_v13 = vld [vmem:[#allocation2 + $0x2c0] sm:$0xff] }
 0x32c   :  { %1041 = vmatpush.bf16.msra.mxu3 %v2948_v11  ;;  %v3702_v11 = vld [vmem:[#allocation2 + $0x2c8] sm:$0xff] }
 0x32f   :  { %1042 = vmatmul.bf16.vlgmr.msra.gmra.mxu3 %v4029_v39  ;;  %1136 = vmatpush.bf16.msrb.mxu0 %v3678_v26 }
 0x330   :  { %v3868_v25 = vpop.eup %3867  ;;  %1407 = vmatpush.bf16.msrb.mxu3 %v3716_v12  ;;  %v732_v58 = vpop.f32.mrf.mxu3 }
 0x331   :  { %v521_v29 = vadd.f32 1.0, %v3868_v25  ;;  %v3870_v56 = vpop.eup %3869  ;;  %v1058_v25 = vmul.f32 0.7978846, %v1057_v24  ;;  %v741_v10 = vadd.f32 %v3837_v8, %v732_v58  ;;  %v3840_v24 = vld [vmem:[%s4128_s5 + $0xe] ss:$0 sm:$0xff] }
 0x332   :  { %v749_v61 = vadd.f32 1.0, %v3870_v56 }
 0x333   :  { %v522_v31 = vmul.f32 %v521_v29, %v514_v28  ;;  %3871 = vtanh.f32 %v1058_v25  ;;  %v3698_v28 = vld [vmem:[#allocation2 + $0x2a8] sm:$0xff]  ;;  %v834_v12 = vmul.f32 %v741_v10, %v741_v10  ;;  %v3657_v25 = vld [vmem:[#allocation2 + $0x1e0] sm:$0xff] }
 0x334   :  { %v750_v2 = vmul.f32 %v749_v61, %v742_v57  ;;  %1408 = vmatpush.bf16.msrb.mxu3 %v3715_v14  ;;  %v3714_v29 = vld [vmem:[#allocation2 + $0x328] sm:$0xff]  ;;  %1304 = vmatpush.bf16.msrb.mxu2 %v3698_v28 }
 0x335   :  { %v523_v36 = vpack.c.bf16 %v522_v31, %v522_v31  ;;  %v3677_v31 = vld [vmem:[#allocation2 + $0x200] sm:$0xff]  ;;  %v835_v14 = vmul.f32 %v834_v12, %v741_v10  ;;  %913 = vmatpush.bf16.msra.mxu1 %v3657_v25  ;;  %v3723_v12 = vld [vmem:[#allocation2 + $0x370] sm:$0xff]  ;;  %v3760_v25 = vld [vmem:[#allocation2 + $0x498] sm:$0xff] }
 0x336   :  { %v751_v6 = vpack.c.bf16 %v750_v2, %v750_v2  ;;  %1137 = vmatpush.bf16.msrb.mxu0 %v3677_v31  ;;  %v3656_v31 = vld [vmem:[#allocation2 + $0x1d8] sm:$0xff] }
 0x337   :  { %599 = vmatmul.bf16.vlgmr.msrb.gmra.mxu1 %v523_v36  ;;  %v3696_v36 = vld [vmem:[#allocation2 + $0x298] sm:$0xff]  ;;  %v836_v15 = vmul.f32 0.044715, %v835_v14  ;;  %v3721_v14 = vld [vmem:[#allocation2 + $0x360] sm:$0xff] }
 0x338   :  { %827 = vmatmul.bf16.vlgmr.msra.gmra.mxu0 %v751_v6  ;;  %1409 = vmatpush.bf16.msrb.mxu3 %v3714_v29  ;;  %v734_v59 = vpop.f32.mrf.mxu3  ;;  %v3705_v6 = vld [vmem:[#allocation2 + $0x2e0] sm:$0xff] }
 0x339   :  { %v3872_v30 = vpop.eup %3871  ;;  %1305 = vmatpush.bf16.msrb.mxu2 %v3697_v32  ;;  %v837_v20 = vadd.f32 %v836_v15, %v741_v10  ;;  %914 = vmatpush.bf16.msra.mxu1 %v3656_v31  ;;  %v3720_v15 = vld [vmem:[#allocation2 + $0x358] sm:$0xff] }
 0x33a   :  { %v1060_v39 = vadd.f32 1.0, %v3872_v30  ;;  %1468 = vmatpush.bf16.msra.mxu0 %v3708_v63  ;;  %v3836_v30 = vld [vmem:[%s4128_s5 + $0x8] ss:$0 sm:$0xff] }
 0x33b   :  { %v838_v22 = vmul.f32 0.7978846, %v837_v20  ;;  %v3717_v20 = vld [vmem:[#allocation2 + $0x340] sm:$0xff] }
 0x33c   :  { %v1061_v34 = vmul.f32 %v1060_v39, %v1053_v27  ;;  %1410 = vmatpush.bf16.msrb.mxu3 %v3713_v33  ;;  %v3839_v27 = vld [vmem:[%s4128_s5 + $0xb] ss:$0 sm:$0xff] }
 0x33d   :  { %1306 = vmatpush.bf16.msrb.mxu2 %v3696_v36 }
 0x33e   :  { %v1062_v35 = vpack.c.bf16 %v1061_v34, %v1061_v34  ;;  %1469 = vmatpush.bf16.msra.mxu0 %v3707_v0  ;;  %v3689_v0 = vld [vmem:[#allocation2 + $0x260] sm:$0xff] }
 0x340   :  { %1411 = vmatpush.bf16.msrb.mxu3 %v3712_v37 }
 0x341   :  { %1307 = vmatpush.bf16.msrb.mxu2 %v3695_v38  ;;  %v3655_v38 = vld [vmem:[#allocation2 + $0x1d0] sm:$0xff] }
 0x342   :  { %1470 = vmatpush.bf16.msra.mxu0 %v3706_v1  ;;  %915 = vmatpush.bf16.msra.mxu1 %v3655_v38  ;;  %v3688_v1 = vld [vmem:[#allocation2 + $0x258] sm:$0xff] }
 0x344   :  { %1412 = vmatpush.bf16.msrb.mxu3 %v3711_v40 }
 0x345   :  { %1308 = vmatpush.bf16.msrb.mxu2 %v3694_v41 }
 0x346   :  { %1471 = vmatpush.bf16.msra.mxu0 %v3705_v6 }
 0x348   :  { %1138 = vmatmul.bf16.vlgmr.msrb.gmra.mxu0 %v1062_v35  ;;  %1413 = vmatpush.bf16.msrb.mxu3 %v3710_v42  ;;  %v833_v42 = vmul.f32 0.5, %v741_v10  ;;  %v3724_v10 = vld [vmem:[#allocation2 + $0x378] sm:$0xff] }
 0x349   :  { %1309 = vmatpush.bf16.msrb.mxu2 %v3693_v43 }
 0x34a   :  { %1472 = vmatpush.bf16.msra.mxu0 %v3704_v7  ;;  %v3686_v7 = vld [vmem:[#allocation2 + $0x248] sm:$0xff] }
 0x34c   :  { %1414 = vmatpush.bf16.msrb.mxu3 %v3709_v44 }
 0x34e   :  { %1473 = vmatpush.bf16.msra.mxu0 %v3703_v9  ;;  %v3685_v9 = vld [vmem:[#allocation2 + $0x240] sm:$0xff] }
 0x352   :  { %1474 = vmatpush.bf16.msra.mxu0 %v3702_v11 }
 0x356   :  { %1475 = vmatpush.bf16.msra.mxu0 %v3701_v13  ;;  %v3722_v13 = vld [vmem:[#allocation2 + $0x368] sm:$0xff] }
 0x3b2   :  { %v1043_v62 = vpop.f32.mrf.mxu3 }
 0x3b3   :  { %v1052_v34 = vadd.f32 %v3839_v27, %v1043_v62  ;;  %v3690_v62 = vld [vmem:[#allocation2 + $0x268] sm:$0xff] }
 0x3b4   :  { %v600_v46 = vpop.f32.mrf.mxu1  ;;  %v3758_v27 = vld [vmem:[#allocation2 + $0x488] sm:$0xff] }
 0x3b5   :  { %v601_v47 = vadd.f32 %v3835_v45, %v600_v46  ;;  %v828_v60 = vpop.f32.mrf.mxu0  ;;  %v1145_v43 = vmul.f32 %v1052_v34, %v1052_v34 }
 0x3b6   :  { %v829_v36 = vadd.f32 %v3836_v30, %v828_v60  ;;  %v3691_v60 = vld [vmem:[#allocation2 + $0x270] sm:$0xff]  ;;  %v3841_v30 = vld [vmem:[%s4128_s5 + $0xf] ss:$0 sm:$0xff] }
 0x3b7   :  { %v605_v48 = vmul.f32 %v601_v47, %v601_v47  ;;  %v604_v54 = vmul.f32 0.5, %v601_v47 }
 0x3b9   :  { %v606_v49 = vmul.f32 %v605_v48, %v601_v47 }
 0x3ba   :  { %v1045_v2 = vpop.f32.mrf.mxu3 }
 0x3bb   :  { %v607_v50 = vmul.f32 0.044715, %v606_v49  ;;  %v3654_v49 = vld [vmem:[#allocation2 + $0x1c8] sm:$0xff] }
 0x3bc   :  { %v602_v51 = vpop.f32.mrf.mxu1  ;;  %916 = vmatpush.bf16.msra.mxu1 %v3654_v49 }
 0x3bd   :  { %v608_v52 = vadd.f32 %v607_v50, %v601_v47  ;;  %v830_v61 = vpop.f32.mrf.mxu0  ;;  %v832_v47 = vpack.c.bf16 %v829_v36, %v829_v36  ;;  %v1146_v51 = vmul.f32 %v1145_v43, %v1052_v34  ;;  %v3729_v43 = vld [vmem:[#allocation2 + $0x3a0] sm:$0xff] }
 0x3bf   :  { %v609_v53 = vmul.f32 0.7978846, %v608_v52 }
 0x3c1   :  { %3873 = vtanh.f32 %v609_v53  ;;  %v1322_v53 = vunpack.c.l.bf16 %v832_v47  ;;  %v3740_v47 = vld [vmem:[#allocation2 + $0x3f8] sm:$0xff] }
 0x3c2   :  { %3875 = vtanh.f32 %v838_v22  ;;  %v3763_v22 = vld [vmem:[#allocation2 + $0x4b0] sm:$0xff]  ;;  %1732 = vmatpush.bf16.msra.mxu3 %v3740_v47 }
 0x3c3   :  { %v3755_v47 = vld [vmem:[#allocation2 + $0x470] sm:$0xff] }
 0x3c5   :  { %v1139_v3 = vpop.f32.mrf.mxu0 }
 0x3c6   :  { %v1140_v26 = vadd.f32 %v3838_v23, %v1139_v3  ;;  %v3687_v3 = vld [vmem:[#allocation2 + $0x250] sm:$0xff]  ;;  %v3762_v23 = vld [vmem:[#allocation2 + $0x4a8] sm:$0xff] }
 0x3c7   :  { %v3874_v17 = vpop.eup %3873 }
 0x3c8   :  { %v611_v55 = vadd.f32 1.0, %v3874_v17  ;;  %v1143_v32 = vpack.c.bf16 %v1140_v26, %v1140_v26  ;;  %v3876_v35 = vpop.eup %3875  ;;  %v3759_v26 = vld [vmem:[#allocation2 + $0x490] sm:$0xff] }
 0x3c9   :  { %v840_v46 = vadd.f32 1.0, %v3876_v35  ;;  %v3732_v35 = vld [vmem:[#allocation2 + $0x3b8] sm:$0xff] }
 0x3ca   :  { %v612_v56 = vmul.f32 %v611_v55, %v604_v54  ;;  %v1317_v40 = vunpack.c.l.bf16 %v1143_v32  ;;  %v3653_v54 = vld [vmem:[#allocation2 + $0x1c0] sm:$0xff]  ;;  %v3692_v55 = vld [vmem:[#allocation2 + $0x278] sm:$0xff]  ;;  %1642 = vmatpush.bf16.msra.mxu2 %v3732_v35 }
 0x3cb   :  { %v841_v52 = vmul.f32 %v840_v46, %v833_v42  ;;  %917 = vmatpush.bf16.msra.mxu1 %v3653_v54  ;;  %v3730_v42 = vld [vmem:[#allocation2 + $0x3a8] sm:$0xff]  ;;  %v3725_v46 = vld [vmem:[#allocation2 + $0x380] sm:$0xff] }
 0x3cc   :  { %v613_v57 = vpack.c.bf16 %v612_v56, %v612_v56 }
 0x3cd   :  { %v1141_v4 = vpop.f32.mrf.mxu0  ;;  %v842_v58 = vpack.c.bf16 %v841_v52, %v841_v52 }
 0x3ce   :  { %1310 = vmatmul.bf16.vlgmr.msrb.gmra.mxu2 %v613_v57  ;;  %1415 = vmatmul.bf16.vlgmr.msrb.gmra.mxu3 %v613_v57  ;;  %v1147_v57 = vmul.f32 0.044715, %v1146_v51  ;;  %v1144_v4 = vmul.f32 0.5, %v1052_v34 }
 0x3cf   :  { %1221 = vmatpush.bf16.msrb.mxu1 %v3692_v55 }
 0x3d0   :  { %v1148_v61 = vadd.f32 %v1147_v57, %v1052_v34  ;;  %918 = vmatmul.bf16.vlgmr.msra.gmra.mxu1 %v842_v58 }
 0x3d2   :  { %v1149_v63 = vmul.f32 0.7978846, %v1148_v61 }
 0x3d3   :  { %1222 = vmatpush.bf16.msrb.mxu1 %v3691_v60 }
 0x3d4   :  { %3877 = vtanh.f32 %v1149_v63  ;;  %v3738_v63 = vld [vmem:[#allocation2 + $0x3e8] sm:$0xff] }
 0x3d7   :  { %1223 = vmatpush.bf16.msrb.mxu1 %v3690_v62 }
 0x3da   :  { %v3878_v2 = vpop.eup %3877 }
 0x3db   :  { %1224 = vmatpush.bf16.msrb.mxu1 %v3689_v0  ;;  %v1151_v6 = vadd.f32 1.0, %v3878_v2  ;;  %v3737_v0 = vld [vmem:[#allocation2 + $0x3e0] sm:$0xff]  ;;  %v3735_v2 = vld [vmem:[#allocation2 + $0x3d0] sm:$0xff] }
 0x3dd   :  { %v1152_v8 = vmul.f32 %v1151_v6, %v1144_v4  ;;  %v3733_v4 = vld [vmem:[#allocation2 + $0x3c0] sm:$0xff]  ;;  %v3748_v6 = vld [vmem:[#allocation2 + $0x438] sm:$0xff] }
 0x3de   :  { %1822 = vmatpush.bf16.msrb.mxu0 %v3748_v6  ;;  %v3842_v6 = vld [vmem:[%s4128_s5 + $0x9] ss:$0 sm:$0xff] }
 0x3df   :  { %1225 = vmatpush.bf16.msrb.mxu1 %v3688_v1  ;;  %v1153_v11 = vpack.c.bf16 %v1152_v8, %v1152_v8  ;;  %v3736_v1 = vld [vmem:[#allocation2 + $0x3d8] sm:$0xff]  ;;  %v3845_v8 = vld [vmem:[%s4128_s5 + $0x11] ss:$0 sm:$0xff] }
 0x3e3   :  { %1226 = vmatpush.bf16.msrb.mxu1 %v3687_v3  ;;  %v3734_v3 = vld [vmem:[#allocation2 + $0x3c8] sm:$0xff] }
 0x3e7   :  { %1227 = vmatpush.bf16.msrb.mxu1 %v3686_v7  ;;  %v3747_v7 = vld [vmem:[#allocation2 + $0x430] sm:$0xff] }
 0x3e8   :  { %1823 = vmatpush.bf16.msrb.mxu0 %v3747_v7 }
 0x3eb   :  { %1228 = vmatpush.bf16.msrb.mxu1 %v3685_v9 }
 0x3ee   :  { %1229 = vmatmul.bf16.vlgmr.msrb.gmra.mxu1 %v1153_v11 }
 0x3ef   :  { %1552 = vmatpush.bf16.msra.mxu1 %v3724_v10 }
 0x3f3   :  { %1553 = vmatpush.bf16.msra.mxu1 %v3723_v12 }
 0x3f7   :  { %1554 = vmatpush.bf16.msra.mxu1 %v3722_v13 }
 0x3fb   :  { %1555 = vmatpush.bf16.msra.mxu1 %v3721_v14 }
 0x3ff   :  { %1556 = vmatpush.bf16.msra.mxu1 %v3720_v15 }
 0x403   :  { %1557 = vmatpush.bf16.msra.mxu1 %v3719_v18 }
 0x407   :  { %1558 = vmatpush.bf16.msra.mxu1 %v3718_v19 }
 0x40b   :  { %1559 = vmatpush.bf16.msra.mxu1 %v3717_v20 }
 0x40f   :  { %1935 = vmatpush.bf16.msrb.mxu1 %v3764_v21 }
 0x413   :  { %1936 = vmatpush.bf16.msrb.mxu1 %v3763_v22 }
 0x417   :  { %1937 = vmatpush.bf16.msrb.mxu1 %v3762_v23 }
 0x44d   :  { %v4067_v32 = vpop.f32.mrf.mxu1 }
 0x451   :  { %v1311_v28 = vpop.f32.mrf.mxu2  ;;  %v4058_v29 = vpop.f32.mrf.mxu3 }
 0x452   :  { %v1312_v39 = vadd.f32 %v3840_v24, %v1311_v28  ;;  %v3761_v24 = vld [vmem:[#allocation2 + $0x4a0] sm:$0xff] }
 0x453   :  { %1938 = vmatpush.bf16.msrb.mxu1 %v3761_v24  ;;  %v3757_v28 = vld [vmem:[#allocation2 + $0x480] sm:$0xff]  ;;  %v3746_v24 = vld [vmem:[#allocation2 + $0x428] sm:$0xff] }
 0x454   :  { %v1315_v33 = vmax.f32 %v1312_v39, 0.0  ;;  %1824 = vmatpush.bf16.msrb.mxu0 %v3746_v24  ;;  %v3765_v24 = vld [vmem:[#allocation2 + $0x4c0] sm:$0xff] }
 0x455   :  { %v921_v38 = vpop.f32.mrf.mxu1 }
 0x456   :  { %v1316_v37 = vpack.c.bf16 %v1315_v33, %v1315_v33 }
 0x457   :  { %1939 = vmatpush.bf16.msrb.mxu1 %v3760_v25  ;;  %v3745_v25 = vld [vmem:[#allocation2 + $0x420] sm:$0xff] }
 0x458   :  { %v1318_v41 = vunpack.c.l.bf16 %v1316_v37  ;;  %v3731_v37 = vld [vmem:[#allocation2 + $0x3b0] sm:$0xff]  ;;  %1825 = vmatpush.bf16.msrb.mxu0 %v3745_v25  ;;  %v3812_v25 = vld [vmem:[#allocation2 + $0x638] sm:$0xff] }
 0x459   :  { %v1313_v44 = vpop.f32.mrf.mxu2  ;;  %v1418_v45 = vpop.f32.mrf.mxu3  ;;  %1643 = vmatpush.bf16.msra.mxu2 %v3731_v37 }
 0x45a   :  { %v1319_v48 = vmul.f32 %v1318_v41, %v1317_v40  ;;  %v3727_v44 = vld [vmem:[#allocation2 + $0x390] sm:$0xff]  ;;  %v3726_v45 = vld [vmem:[#allocation2 + $0x388] sm:$0xff] }
 0x45b   :  { %1940 = vmatpush.bf16.msrb.mxu1 %v3759_v26  ;;  %v3744_v26 = vld [vmem:[#allocation2 + $0x418] sm:$0xff] }
 0x45c   :  { %v1320_v50 = vpack.c.bf16 %v1319_v48, %v1319_v48  ;;  %v3739_v48 = vld [vmem:[#allocation2 + $0x3f0] sm:$0xff]  ;;  %1826 = vmatpush.bf16.msrb.mxu0 %v3744_v26 }
 0x45d   :  { %1644 = vmatpush.bf16.msra.mxu2 %v3730_v42  ;;  %1733 = vmatpush.bf16.msra.mxu3 %v3739_v48  ;;  %v3754_v48 = vld [vmem:[#allocation2 + $0x468] sm:$0xff] }
 0x45e   :  { %v1321_v17 = vunpack.c.l.bf16 %v1320_v50 }
 0x45f   :  { %1941 = vmatpush.bf16.msrb.mxu1 %v3758_v27  ;;  %v3743_v27 = vld [vmem:[#allocation2 + $0x410] sm:$0xff] }
 0x460   :  { %v1323_v56 = vadd.f32 %v1322_v53, %v1321_v17  ;;  %1827 = vmatpush.bf16.msrb.mxu0 %v3743_v27 }
 0x461   :  { %1645 = vmatpush.bf16.msra.mxu2 %v3729_v43  ;;  %1734 = vmatpush.bf16.msra.mxu3 %v3738_v63 }
 0x462   :  { %v1324_v59 = vpack.c.bf16 %v1323_v56, %v1323_v56 }
 0x463   :  { %1942 = vmatpush.bf16.msrb.mxu1 %v3757_v28  ;;  %v3742_v28 = vld [vmem:[#allocation2 + $0x408] sm:$0xff] }
 0x464   :  { %1476 = vmatmul.bf16.vlgmr.msra.gmra.mxu0 %v1324_v59 }
 0x465   :  { %1735 = vmatpush.bf16.msra.mxu3 %v3737_v0  ;;  %1828 = vmatpush.bf16.msrb.mxu0 %v3742_v28  ;;  %v3770_v0 = vld [vmem:[#allocation2 + $0x4e8] sm:$0xff] }
 0x466   :  { %v3810_v28 = vld [vmem:[#allocation2 + $0x628] sm:$0xff] }
 0x469   :  { %1736 = vmatpush.bf16.msra.mxu3 %v3736_v1  ;;  %v3843_v1 = vld [vmem:[%s4128_s5 + $0xd] ss:$0 sm:$0xff] }
 0x46b   :  { %v4070_v40 = vpop.f32.mrf.mxu1 }
 0x46d   :  { %1737 = vmatpush.bf16.msra.mxu3 %v3735_v2  ;;  %v3769_v2 = vld [vmem:[#allocation2 + $0x4e0] sm:$0xff] }
 0x471   :  { %1738 = vmatpush.bf16.msra.mxu3 %v3734_v3  ;;  %v1231_v3 = vadd.f32 %v3843_v1, %v4070_v40  ;;  %v3786_v1 = vld [vmem:[#allocation2 + $0x568] sm:$0xff] }
 0x473   :  { %v1232_v41 = vpop.f32.mrf.mxu1 }
 0x475   :  { %1739 = vmatpush.bf16.msra.mxu3 %v3733_v4 }
 0x4e1   :  { %v1477_v39 = vpop.f32.mrf.mxu0 }
 0x4e2   :  { %v1478_v31 = vadd.f32 %v1477_v39, %v4058_v29  ;;  %v3728_v29 = vld [vmem:[#allocation2 + $0x398] sm:$0xff]  ;;  %v3846_v39 = vld [vmem:[%s4128_s5 + $0x12] ss:$0 sm:$0xff] }
 0x4e3   :  { %1646 = vmatpush.bf16.msra.mxu2 %v3728_v29 }
 0x4e4   :  { %v1483_v33 = vadd.f32 %v3841_v30, %v1478_v31  ;;  %v3741_v30 = vld [vmem:[#allocation2 + $0x400] sm:$0xff] }
 0x4e5   :  { %1829 = vmatpush.bf16.msrb.mxu0 %v3741_v30  ;;  %v3809_v30 = vld [vmem:[#allocation2 + $0x620] sm:$0xff] }
 0x4e6   :  { %v1484_v34 = vpack.c.bf16 %v1483_v33, %v1483_v33 }
 0x4e7   :  { %1647 = vmatpush.bf16.msra.mxu2 %v3727_v44 }
 0x4e8   :  { %1560 = vmatmul.bf16.vlgmr.msra.gmra.mxu1 %v1484_v34 }
 0x4e9   :  { %v1479_v36 = vpop.f32.mrf.mxu0 }
 0x4eb   :  { %1648 = vmatpush.bf16.msra.mxu2 %v3726_v45 }
 0x4ef   :  { %1649 = vmatpush.bf16.msra.mxu2 %v3725_v46  ;;  %v3756_v46 = vld [vmem:[#allocation2 + $0x478] sm:$0xff] }
 0x4f3   :  { %1996 = vmatpush.bf16.msrb.mxu2 %v3756_v46  ;;  %v3776_v46 = vld [vmem:[#allocation2 + $0x518] sm:$0xff] }
 0x4f7   :  { %1997 = vmatpush.bf16.msrb.mxu2 %v3755_v47  ;;  %v3775_v47 = vld [vmem:[#allocation2 + $0x510] sm:$0xff] }
 0x4f8   :  { %1943 = vmatmul.bf16.vlgmr.msrb.gmra.mxu1 %v4020_v16  ;;  %v3844_v16 = vld [vmem:[%s4128_s5 + $0x10] ss:$0 sm:$0xff] }
 0x4fb   :  { %1998 = vmatpush.bf16.msrb.mxu2 %v3754_v48  ;;  %v3774_v48 = vld [vmem:[#allocation2 + $0x508] sm:$0xff] }
 0x565   :  { %v1561_v49 = vpop.f32.mrf.mxu1 }
 0x566   :  { %v1562_v50 = vadd.f32 %v3844_v16, %v1561_v49  ;;  %v3753_v16 = vld [vmem:[#allocation2 + $0x460] sm:$0xff]  ;;  %v3752_v49 = vld [vmem:[#allocation2 + $0x458] sm:$0xff] }
 0x567   :  { %1999 = vmatpush.bf16.msrb.mxu2 %v3753_v16  ;;  %v3773_v16 = vld [vmem:[#allocation2 + $0x500] sm:$0xff] }
 0x568   :  { %v1566_v51 = vmul.f32 %v1562_v50, %v1562_v50  ;;  %v1565_v58 = vmul.f32 0.5, %v1562_v50 }
 0x56a   :  { %v1567_v52 = vmul.f32 %v1566_v51, %v1562_v50  ;;  %v3750_v51 = vld [vmem:[#allocation2 + $0x448] sm:$0xff] }
 0x56b   :  { %2000 = vmatpush.bf16.msrb.mxu2 %v3752_v49  ;;  %v3788_v49 = vld [vmem:[#allocation2 + $0x578] sm:$0xff] }
 0x56c   :  { %v1568_v53 = vmul.f32 0.044715, %v1567_v52  ;;  %v3847_v52 = vld [vmem:[%s4128_s5 + $0x13] ss:$0 sm:$0xff]  ;;  %2260 = vmatpush.bf16.msra.mxu1 %v3788_v49  ;;  %v3800_v49 = vld [vmem:[#allocation2 + $0x5d8] sm:$0xff] }
 0x56d   :  { %v1563_v17 = vpop.f32.mrf.mxu1 }
 0x56e   :  { %v1569_v54 = vadd.f32 %v1568_v53, %v1562_v50  ;;  %v3751_v50 = vld [vmem:[#allocation2 + $0x450] sm:$0xff]  ;;  %v3749_v53 = vld [vmem:[#allocation2 + $0x440] sm:$0xff] }
 0x56f   :  { %2001 = vmatpush.bf16.msrb.mxu2 %v3751_v50  ;;  %v3849_v50 = vld [vmem:[%s4128_s5 + $0x15] ss:$0 sm:$0xff] }
 0x570   :  { %v1570_v55 = vmul.f32 0.7978846, %v1569_v54 }
 0x572   :  { %3879 = vtanh.f32 %v1570_v55 }
 0x573   :  { %2002 = vmatpush.bf16.msrb.mxu2 %v3750_v51 }
 0x575   :  { %v4075_v56 = vpop.f32.mrf.mxu1 }
 0x577   :  { %2003 = vmatpush.bf16.msrb.mxu2 %v3749_v53 }
 0x578   :  { %v3880_v57 = vpop.eup %3879 }
 0x579   :  { %v1572_v59 = vadd.f32 1.0, %v3880_v57 }
 0x57b   :  { %v1573_v60 = vmul.f32 %v1572_v59, %v1565_v58  ;;  %v3772_v58 = vld [vmem:[#allocation2 + $0x4f8] sm:$0xff] }
 0x57c   :  { %2080 = vmatpush.bf16.msrb.mxu3 %v3772_v58 }
 0x57d   :  { %v1946_v61 = vpop.f32.mrf.mxu1  ;;  %v1574_v62 = vpack.c.bf16 %v1573_v60, %v1573_v60 }
 0x57e   :  { %v3771_v61 = vld [vmem:[#allocation2 + $0x4f0] sm:$0xff] }
 0x57f   :  { %1650 = vmatmul.bf16.vlgmr.msra.gmra.mxu2 %v1574_v62 }
 0x580   :  { %2081 = vmatpush.bf16.msrb.mxu3 %v3771_v61 }
 0x584   :  { %2082 = vmatpush.bf16.msrb.mxu3 %v3770_v0 }
 0x588   :  { %2083 = vmatpush.bf16.msrb.mxu3 %v3769_v2  ;;  %v3785_v2 = vld [vmem:[#allocation2 + $0x560] sm:$0xff] }
 0x602   :  { %v1651_v9 = vpop.f32.mrf.mxu2 }
 0x603   :  { %v1652_v10 = vadd.f32 %v3845_v8, %v1651_v9  ;;  %v3768_v9 = vld [vmem:[#allocation2 + $0x4d8] sm:$0xff] }
 0x604   :  { %2084 = vmatpush.bf16.msrb.mxu3 %v3768_v9  ;;  %v3795_v9 = vld [vmem:[#allocation2 + $0x5b0] sm:$0xff] }
 0x605   :  { %v1656_v11 = vmul.f32 %v1652_v10, %v1652_v10  ;;  %v1655_v20 = vmul.f32 0.5, %v1652_v10 }
 0x607   :  { %v1657_v12 = vmul.f32 %v1656_v11, %v1652_v10 }
 0x609   :  { %v1658_v13 = vmul.f32 0.044715, %v1657_v12  ;;  %v920_v12 = vadd.f32 %v3842_v6, %v4067_v32  ;;  %v3811_v32 = vld [vmem:[#allocation2 + $0x630] sm:$0xff]  ;;  %v3782_v6 = vld [vmem:[#allocation2 + $0x548] sm:$0xff] }
 0x60a   :  { %v1653_v14 = vpop.f32.mrf.mxu2 }
 0x60b   :  { %v1659_v15 = vadd.f32 %v1658_v13, %v1652_v10  ;;  %v1234_v10 = vpack.c.bf16 %v1231_v3, %v1231_v3  ;;  %v3767_v14 = vld [vmem:[#allocation2 + $0x4d0] sm:$0xff]  ;;  %v3784_v3 = vld [vmem:[#allocation2 + $0x558] sm:$0xff] }
 0x60c   :  { %2085 = vmatpush.bf16.msrb.mxu3 %v3767_v14 }
 0x60d   :  { %v1660_v18 = vmul.f32 0.7978846, %v1659_v15  ;;  %v1845_v15 = vunpack.c.l.bf16 %v1234_v10  ;;  %v3850_v10 = vld [vmem:[%s4128_s5 + $0x16] ss:$0 sm:$0xff] }
 0x60f   :  { %3881 = vtanh.f32 %v1660_v18 }
 0x615   :  { %v3882_v19 = vpop.eup %3881 }
 0x616   :  { %v1662_v21 = vadd.f32 1.0, %v3882_v19  ;;  %v923_v19 = vpack.c.bf16 %v920_v12, %v920_v12 }
 0x618   :  { %v1663_v22 = vmul.f32 %v1662_v21, %v1655_v20  ;;  %v3766_v20 = vld [vmem:[#allocation2 + $0x4c8] sm:$0xff] }
 0x619   :  { %2086 = vmatpush.bf16.msrb.mxu3 %v3766_v20 }
 0x61a   :  { %v1664_v23 = vpack.c.bf16 %v1663_v22, %v1663_v22  ;;  %v1850_v22 = vunpack.c.l.bf16 %v923_v19 }
 0x61c   :  { %1740 = vmatmul.bf16.vlgmr.msra.gmra.mxu3 %v1664_v23 }
 0x61d   :  { %2087 = vmatpush.bf16.msrb.mxu3 %v3765_v24 }
 0x621   :  { %2455 = vmatpush.bf16.msra.mxu3 %v3812_v25  ;;  %v3794_v25 = vld [vmem:[#allocation2 + $0x5a8] sm:$0xff] }
 0x625   :  { %2456 = vmatpush.bf16.msra.mxu3 %v3811_v32  ;;  %v3791_v32 = vld [vmem:[#allocation2 + $0x590] sm:$0xff] }
 0x629   :  { %2457 = vmatpush.bf16.msra.mxu3 %v3810_v28  ;;  %v3790_v28 = vld [vmem:[#allocation2 + $0x588] sm:$0xff] }
 0x62d   :  { %2458 = vmatpush.bf16.msra.mxu3 %v3809_v30  ;;  %v3789_v30 = vld [vmem:[#allocation2 + $0x580] sm:$0xff] }
 0x69f   :  { %v1741_v31 = vpop.f32.mrf.mxu3 }
 0x6a0   :  { %v1742_v33 = vadd.f32 %v3846_v39, %v1741_v31  ;;  %v3808_v39 = vld [vmem:[#allocation2 + $0x618] sm:$0xff]  ;;  %v3807_v31 = vld [vmem:[#allocation2 + $0x610] sm:$0xff] }
 0x6a1   :  { %2459 = vmatpush.bf16.msra.mxu3 %v3808_v39  ;;  %v3804_v39 = vld [vmem:[#allocation2 + $0x5f8] sm:$0xff] }
 0x6a2   :  { %v1746_v34 = vmul.f32 %v1742_v33, %v1742_v33  ;;  %v1745_v43 = vmul.f32 0.5, %v1742_v33 }
 0x6a4   :  { %v1747_v35 = vmul.f32 %v1746_v34, %v1742_v33  ;;  %v3805_v34 = vld [vmem:[#allocation2 + $0x600] sm:$0xff] }
 0x6a5   :  { %2460 = vmatpush.bf16.msra.mxu3 %v3807_v31  ;;  %v3803_v31 = vld [vmem:[#allocation2 + $0x5f0] sm:$0xff] }
 0x6a6   :  { %v1748_v36 = vmul.f32 0.044715, %v1747_v35  ;;  %v3780_v35 = vld [vmem:[#allocation2 + $0x538] sm:$0xff] }
 0x6a7   :  { %v1743_v37 = vpop.f32.mrf.mxu3  ;;  %2170 = vmatpush.bf16.msra.mxu0 %v3780_v35 }
 0x6a8   :  { %v1749_v38 = vadd.f32 %v1748_v36, %v1742_v33  ;;  %v3806_v33 = vld [vmem:[#allocation2 + $0x608] sm:$0xff]  ;;  %v3779_v36 = vld [vmem:[#allocation2 + $0x530] sm:$0xff] }
 0x6a9   :  { %2461 = vmatpush.bf16.msra.mxu3 %v3806_v33  ;;  %v3848_v37 = vld [vmem:[%s4128_s5 + $0x14] ss:$0 sm:$0xff]  ;;  %v3851_v33 = vld [vmem:[%s4128_s5 + $0x17] ss:$0 sm:$0xff] }
 0x6aa   :  { %v1750_v41 = vmul.f32 0.7978846, %v1749_v38 }
 0x6ab   :  { %2171 = vmatpush.bf16.msra.mxu0 %v3779_v36 }
 0x6ac   :  { %3883 = vtanh.f32 %v1750_v41 }
 0x6ad   :  { %2462 = vmatpush.bf16.msra.mxu3 %v3805_v34 }
 0x6b2   :  { %v3884_v42 = vpop.eup %3883 }
 0x6b3   :  { %v1752_v29 = vadd.f32 1.0, %v3884_v42 }
 0x6b5   :  { %v1753_v44 = vmul.f32 %v1752_v29, %v1745_v43 }
 0x6b7   :  { %v1754_v45 = vpack.c.bf16 %v1753_v44, %v1753_v44  ;;  %v3778_v44 = vld [vmem:[#allocation2 + $0x528] sm:$0xff] }
 0x6b8   :  { %2172 = vmatpush.bf16.msra.mxu0 %v3778_v44 }
 0x6b9   :  { %1830 = vmatmul.bf16.vlgmr.msrb.gmra.mxu0 %v1754_v45  ;;  %v3777_v45 = vld [vmem:[#allocation2 + $0x520] sm:$0xff] }
 0x6bc   :  { %2173 = vmatpush.bf16.msra.mxu0 %v3777_v45 }
 0x6c0   :  { %2174 = vmatpush.bf16.msra.mxu0 %v3776_v46 }
 0x6c4   :  { %2175 = vmatpush.bf16.msra.mxu0 %v3775_v47 }
 0x6c8   :  { %2176 = vmatpush.bf16.msra.mxu0 %v3774_v48  ;;  %v3802_v48 = vld [vmem:[#allocation2 + $0x5e8] sm:$0xff] }
 0x6cc   :  { %2177 = vmatpush.bf16.msra.mxu0 %v3773_v16  ;;  %v3801_v16 = vld [vmem:[#allocation2 + $0x5e0] sm:$0xff] }
 0x6d0   :  { %2516 = vmatpush.bf16.msrb.mxu0 %v3804_v39 }
 0x6d4   :  { %2517 = vmatpush.bf16.msrb.mxu0 %v3803_v31 }
 0x6d8   :  { %2518 = vmatpush.bf16.msrb.mxu0 %v3802_v48 }
 0x6dc   :  { %2519 = vmatpush.bf16.msrb.mxu0 %v3801_v16 }
 0x6e0   :  { %2520 = vmatpush.bf16.msrb.mxu0 %v3800_v49 }
 0x736   :  { %v1831_v17 = vpop.f32.mrf.mxu0 }
 0x737   :  { %v1832_v54 = vadd.f32 %v3847_v52, %v1831_v17 }
 0x739   :  { %v1836_v55 = vmul.f32 %v1832_v54, %v1832_v54  ;;  %v1835_v7 = vmul.f32 0.5, %v1832_v54 }
 0x73b   :  { %v1837_v57 = vmul.f32 %v1836_v55, %v1832_v54 }
 0x73d   :  { %v1838_v59 = vmul.f32 0.044715, %v1837_v57 }
 0x73e   :  { %v1833_v60 = vpop.f32.mrf.mxu0 }
 0x73f   :  { %v1839_v62 = vadd.f32 %v1838_v59, %v1832_v54 }
 0x741   :  { %v1840_v63 = vmul.f32 0.7978846, %v1839_v62 }
 0x743   :  { %3885 = vtanh.f32 %v1840_v63 }
 0x749   :  { %v3886_v4 = vpop.eup %3885 }
 0x74a   :  { %v1842_v8 = vadd.f32 1.0, %v3886_v4  ;;  %v3783_v4 = vld [vmem:[#allocation2 + $0x550] sm:$0xff] }
 0x74c   :  { %v1843_v11 = vmul.f32 %v1842_v8, %v1835_v7  ;;  %v3781_v7 = vld [vmem:[#allocation2 + $0x540] sm:$0xff]  ;;  %v3796_v8 = vld [vmem:[#allocation2 + $0x5b8] sm:$0xff] }
 0x74d   :  { %2350 = vmatpush.bf16.msra.mxu2 %v3796_v8 }
 0x74e   :  { %v1844_v13 = vpack.c.bf16 %v1843_v11, %v1843_v11 }
 0x750   :  { %v1846_v18 = vunpack.c.l.bf16 %v1844_v13 }
 0x751   :  { %2351 = vmatpush.bf16.msra.mxu2 %v3795_v9  ;;  %v3814_v9 = vld [vmem:[#allocation2 + $0x648] sm:$0xff] }
 0x752   :  { %v1847_v40 = vmul.f32 %v1846_v18, %v1845_v15 }
 0x754   :  { %v1848_v21 = vpack.c.bf16 %v1847_v40, %v1847_v40 }
 0x755   :  { %2352 = vmatpush.bf16.msra.mxu2 %v3794_v25 }
 0x756   :  { %v1849_v23 = vunpack.c.l.bf16 %v1848_v21 }
 0x758   :  { %v1851_v26 = vadd.f32 %v1850_v22, %v1849_v23 }
 0x75a   :  { %v1852_v27 = vpack.c.bf16 %v1851_v26, %v1851_v26  ;;  %v3793_v26 = vld [vmem:[#allocation2 + $0x5a0] sm:$0xff] }
 0x75b   :  { %2353 = vmatpush.bf16.msra.mxu2 %v3793_v26 }
 0x75c   :  { %2004 = vmatmul.bf16.vlgmr.msrb.gmra.mxu2 %v1852_v27  ;;  %v3792_v27 = vld [vmem:[#allocation2 + $0x598] sm:$0xff] }
 0x75f   :  { %2354 = vmatpush.bf16.msra.mxu2 %v3792_v27 }
 0x763   :  { %2355 = vmatpush.bf16.msra.mxu2 %v3791_v32 }
 0x767   :  { %2356 = vmatpush.bf16.msra.mxu2 %v3790_v28 }
 0x76b   :  { %2357 = vmatpush.bf16.msra.mxu2 %v3789_v30 }
 0x7df   :  { %v2005_v38 = vpop.f32.mrf.mxu2 }
 0x7e0   :  { %v2006_v41 = vadd.f32 %v2005_v38, %v4075_v56  ;;  %v3787_v56 = vld [vmem:[#allocation2 + $0x570] sm:$0xff] }
 0x7e1   :  { %2261 = vmatpush.bf16.msra.mxu1 %v3787_v56  ;;  %v3799_v56 = vld [vmem:[#allocation2 + $0x5d0] sm:$0xff] }
 0x7e2   :  { %v2011_v42 = vadd.f32 %v3848_v37, %v2006_v41  ;;  %2521 = vmatpush.bf16.msrb.mxu0 %v3799_v56 }
 0x7e4   :  { %v2012_v43 = vpack.c.bf16 %v2011_v42, %v2011_v42 }
 0x7e5   :  { %2262 = vmatpush.bf16.msra.mxu1 %v3786_v1 }
 0x7e6   :  { %2088 = vmatmul.bf16.vlgmr.msrb.gmra.mxu3 %v2012_v43 }
 0x7e7   :  { %v2007_v29 = vpop.f32.mrf.mxu2 }
 0x7e9   :  { %2263 = vmatpush.bf16.msra.mxu1 %v3785_v2  ;;  %v3815_v2 = vld [vmem:[#allocation2 + $0x650] sm:$0xff] }
 0x7ed   :  { %2264 = vmatpush.bf16.msra.mxu1 %v3784_v3 }
 0x7f1   :  { %2265 = vmatpush.bf16.msra.mxu1 %v3783_v4 }
 0x7f5   :  { %2266 = vmatpush.bf16.msra.mxu1 %v3782_v6 }
 0x7f6   :  { %2463 = vmatmul.bf16.vlgmr.msra.gmra.mxu3 %v4008_v5 }
 0x7f9   :  { %2267 = vmatpush.bf16.msra.mxu1 %v3781_v7 }
 0x869   :  { %v2089_v5 = vpop.f32.mrf.mxu3 }
 0x86a   :  { %v2090_v51 = vadd.f32 %v3849_v50, %v2089_v5  ;;  %v3798_v50 = vld [vmem:[#allocation2 + $0x5c8] sm:$0xff]  ;;  %v3797_v5 = vld [vmem:[#allocation2 + $0x5c0] sm:$0xff] }
 0x86b   :  { %2522 = vmatpush.bf16.msrb.mxu0 %v3798_v50 }
 0x86c   :  { %v2094_v52 = vmul.f32 %v2090_v51, %v2090_v51  ;;  %v2093_v60 = vmul.f32 0.5, %v2090_v51 }
 0x86e   :  { %v2095_v53 = vmul.f32 %v2094_v52, %v2090_v51  ;;  %v3819_v52 = vld [vmem:[#allocation2 + $0x670] sm:$0xff] }
 0x86f   :  { %2523 = vmatpush.bf16.msrb.mxu0 %v3797_v5 }
 0x870   :  { %v2096_v17 = vmul.f32 0.044715, %v2095_v53  ;;  %v3852_v53 = vld [vmem:[%s4128_s5 + $0x18] ss:$0 sm:$0xff] }
 0x871   :  { %v2091_v54 = vpop.f32.mrf.mxu3 }
 0x872   :  { %v2097_v55 = vadd.f32 %v2096_v17, %v2090_v51  ;;  %v3820_v51 = vld [vmem:[#allocation2 + $0x678] sm:$0xff]  ;;  %v3818_v54 = vld [vmem:[#allocation2 + $0x668] sm:$0xff] }
 0x873   :  { %2601 = vmatpush.bf16.msrb.mxu1 %v3820_v51 }
 0x874   :  { %v2098_v57 = vmul.f32 0.7978846, %v2097_v55 }
 0x876   :  { %3887 = vtanh.f32 %v2098_v57 }
 0x877   :  { %2602 = vmatpush.bf16.msrb.mxu1 %v3819_v52 }
 0x879   :  { %v4102_v58 = vpop.f32.mrf.mxu3 }
 0x87b   :  { %2603 = vmatpush.bf16.msrb.mxu1 %v3818_v54 }
 0x87c   :  { %v3888_v59 = vpop.eup %3887 }
 0x87d   :  { %v2100_v61 = vadd.f32 1.0, %v3888_v59  ;;  %v3817_v59 = vld [vmem:[#allocation2 + $0x660] sm:$0xff] }
 0x87f   :  { %v2101_v62 = vmul.f32 %v2100_v61, %v2093_v60  ;;  %2604 = vmatpush.bf16.msrb.mxu1 %v3817_v59 }
 0x881   :  { %v2466_v63 = vpop.f32.mrf.mxu3  ;;  %v2102_v0 = vpack.c.bf16 %v2101_v62, %v2101_v62 }
 0x882   :  { %v3816_v63 = vld [vmem:[#allocation2 + $0x658] sm:$0xff] }
 0x883   :  { %2178 = vmatmul.bf16.vlgmr.msra.gmra.mxu0 %v2102_v0  ;;  %2605 = vmatpush.bf16.msrb.mxu1 %v3816_v63 }
 0x887   :  { %2606 = vmatpush.bf16.msrb.mxu1 %v3815_v2 }
 0x88b   :  { %2607 = vmatpush.bf16.msrb.mxu1 %v3814_v9 }
 0x900   :  { %v2179_v11 = vpop.f32.mrf.mxu0 }
 0x901   :  { %v2180_v12 = vadd.f32 %v3850_v10, %v2179_v11  ;;  %v3813_v10 = vld [vmem:[#allocation2 + $0x640] sm:$0xff]  ;;  %v3853_v11 = vld [vmem:[%s4128_s5 + $0x19] ss:$0 sm:$0xff] }
 0x902   :  { %2608 = vmatpush.bf16.msrb.mxu1 %v3813_v10 }
 0x903   :  { %v2184_v13 = vmul.f32 %v2180_v12, %v2180_v12  ;;  %v2183_v21 = vmul.f32 0.5, %v2180_v12 }
 0x905   :  { %v2185_v14 = vmul.f32 %v2184_v13, %v2180_v12 }
 0x907   :  { %v2186_v15 = vmul.f32 0.044715, %v2185_v14 }
 0x908   :  { %v2181_v18 = vpop.f32.mrf.mxu0 }
 0x909   :  { %v2187_v19 = vadd.f32 %v2186_v15, %v2180_v12 }
 0x90b   :  { %v2188_v40 = vmul.f32 0.7978846, %v2187_v19 }
 0x90d   :  { %3889 = vtanh.f32 %v2188_v40  ;;  %v3854_v40 = vld [vmem:[%s4128_s5 + $0x1a] ss:$0 sm:$0xff] }
 0x913   :  { %v3890_v20 = vpop.eup %3889 }
 0x914   :  { %v2190_v22 = vadd.f32 1.0, %v3890_v20 }
 0x916   :  { %v2191_v23 = vmul.f32 %v2190_v22, %v2183_v21 }
 0x918   :  { %v2192_v24 = vpack.c.bf16 %v2191_v23, %v2191_v23 }
 0x91a   :  { %2268 = vmatmul.bf16.vlgmr.msra.gmra.mxu1 %v2192_v24 }
 0x997   :  { %v2269_v34 = vpop.f32.mrf.mxu1 }
 0x998   :  { %v2270_v35 = vadd.f32 %v3851_v33, %v2269_v34 }
 0x99a   :  { %v2274_v36 = vmul.f32 %v2270_v35, %v2270_v35  ;;  %v2273_v44 = vmul.f32 0.5, %v2270_v35 }
 0x99c   :  { %v2275_v37 = vmul.f32 %v2274_v36, %v2270_v35 }
 0x99e   :  { %v2276_v38 = vmul.f32 0.044715, %v2275_v37 }
 0x99f   :  { %v2271_v41 = vpop.f32.mrf.mxu1 }
 0x9a0   :  { %v2277_v42 = vadd.f32 %v2276_v38, %v2270_v35 }
 0x9a2   :  { %v2278_v43 = vmul.f32 0.7978846, %v2277_v42 }
 0x9a4   :  { %3891 = vtanh.f32 %v2278_v43 }
 0x9aa   :  { %v3892_v29 = vpop.eup %3891 }
 0x9ab   :  { %v2280_v45 = vadd.f32 1.0, %v3892_v29 }
 0x9ad   :  { %v2281_v46 = vmul.f32 %v2280_v45, %v2273_v44 }
 0x9af   :  { %v2282_v47 = vpack.c.bf16 %v2281_v46, %v2281_v46 }
 0x9b1   :  { %2358 = vmatmul.bf16.vlgmr.msra.gmra.mxu2 %v2282_v47 }
 0xa34   :  { %v2359_v17 = vpop.f32.mrf.mxu2 }
 0xa35   :  { %v2360_v55 = vadd.f32 %v3852_v53, %v2359_v17 }
 0xa37   :  { %v2364_v57 = vmul.f32 %v2360_v55, %v2360_v55  ;;  %v2363_v4 = vmul.f32 0.5, %v2360_v55 }
 0xa39   :  { %v2365_v60 = vmul.f32 %v2364_v57, %v2360_v55 }
 0xa3b   :  { %v2366_v61 = vmul.f32 0.044715, %v2365_v60 }
 0xa3c   :  { %v2361_v62 = vpop.f32.mrf.mxu2 }
 0xa3d   :  { %v2367_v0 = vadd.f32 %v2366_v61, %v2360_v55 }
 0xa3f   :  { %v2368_v1 = vmul.f32 0.7978846, %v2367_v0 }
 0xa41   :  { %3893 = vtanh.f32 %v2368_v1 }
 0xa47   :  { %v3894_v3 = vpop.eup %3893 }
 0xa48   :  { %v2370_v6 = vadd.f32 1.0, %v3894_v3 }
 0xa4a   :  { %v2371_v7 = vmul.f32 %v2370_v6, %v2363_v4 }
 0xa4c   :  { %v2372_v8 = vpack.c.bf16 %v2371_v7, %v2371_v7 }
 0xa4e   :  { %2524 = vmatmul.bf16.vlgmr.msrb.gmra.mxu0 %v2372_v8 }
 0xacb   :  { %v2525_v12 = vpop.f32.mrf.mxu0 }
 0xacc   :  { %v2526_v13 = vadd.f32 %v2525_v12, %v4102_v58 }
 0xace   :  { %v2531_v14 = vadd.f32 %v3853_v11, %v2526_v13 }
 0xad0   :  { %v2532_v15 = vmax.f32 %v2531_v14, 0.0 }
 0xad2   :  { %v2533_v18 = vpack.c.bf16 %v2532_v15, %v2532_v15 }
 0xad3   :  { %v2527_v19 = vpop.f32.mrf.mxu0 }
 0xad4   :  { %2609 = vmatmul.bf16.vlgmr.msrb.gmra.mxu1 %v2533_v18 }
 0xb51   :  { %v2610_v20 = vpop.f32.mrf.mxu1 }
 0xb52   :  { %v2611_v21 = vadd.f32 %v3854_v40, %v2610_v20 }
 0xb54   :  { %2614 = vst [vmem:[%s4129_s6] sm:$0xff] %v2611_v21 }
 0xb59   :  { %v2612_v22 = vpop.f32.mrf.mxu1 }
 0xb5a   :  { %2619 = vsyncpa [#allocation3], 1 }
 0xb5b   :  { %2620 = vsyncpa [#allocation5], 1 }

</bundles_post_ra>
